<compile_context>
chip_gen: v7x
topology: tpu7x:2x2x1
jax: 0.10.0
libtpu: 0.0.40
codegen_flags: <defaults>
</compile_context>

<pallas_src>
import functools

import jax
import jax.numpy as jnp
from jax.experimental import pallas as pl
from jax.experimental.pallas import tpu as pltpu

_CHUNK_SEQS = 1024     # sequences per inner chunk: one (8, 128) f32 vreg slab per value
_CHUNK_LANES = 128


def _ceil_div(a: int, b: int) -> int:
    return -(-a // b)


def _pick_tiling(s: int, max_tile: int):
    """Pick (sequences per grid step, number of grid steps).

    Tiles are multiples of 1024 sequences (one packed (8,128) slab per chunk).
    Prefer an even tile count >= 2 so the 'parallel' grid axis balances across
    the two TensorCores of a v7x chip.
    """
    unit = _CHUNK_SEQS
    max_units = max(1, max_tile // unit)
    units = max(1, _ceil_div(s, unit))
    if units == 1:
        return unit, 1
    n_target = 2 * _ceil_div(_ceil_div(units, max_units), 2)   # smallest even count
    tile_units = _ceil_div(units, n_target)
    n_tiles = _ceil_div(units, tile_units)                     # actual (even except corner cases)
    return tile_units * unit, n_tiles


def _st_meta_kernel(x_ref, w_ih_ref, w_hh_ref, b_ref, w2_ref, o_ref):
    """One grid step = `cps` chunks of 1024 sequences (each an (8,128) slab).

    x_ref  : (T*D, cps, 8, 128)  VMEM bf16  time/feature-major, sequences on (sublane, lane)
    w_ih_ref: (3*D,)             SMEM f32   GRU input weights, flat [r(D), z(D), n(D)]
    w_hh_ref: (3,)               SMEM f32   GRU hidden weights (hidden size == 1)
    b_ref  : (4,)                SMEM f32   [b_ir+b_hr, b_iz+b_hz, b_in, b_hn]
    w2_ref : (meta*8, T*8 + 8)   VMEM f32   sublane-expanded mk weight, bias folded into
                                            the trailing 8 columns (paired with a ones slab)
    o_ref  : (meta, cps, 8, 128) VMEM f32
    """
    td, cps, sub, cl = x_ref.shape
    k_aug = w2_ref.shape[1]                 # T*8 + 8
    n_steps = (k_aug - sub) // sub          # T
    msg_dim = td // n_steps                 # D
    meta_dim = o_ref.shape[0]
    slab = (sub, cl)

    # Loop-invariant slabs, hoisted (JAX does not CSE broadcast_in_dim).
    b_r = jnp.full(slab, b_ref[0], jnp.float32)
    b_z = jnp.full(slab, b_ref[1], jnp.float32)
    b_in = jnp.full(slab, b_ref[2], jnp.float32)
    b_hn = jnp.full(slab, b_ref[3], jnp.float32)
    ones = jnp.ones(slab, jnp.float32)

    @pl.loop(0, cps)
    def _chunk(c):
        # ---- GRU(hidden=1) recurrence, fully vectorised over 1024 sequences ----
        # Channel mixes are tiny (D = message_dim), so the gates stay on the VPU
        # as unrolled broadcast-MACs with scalar weights from SMEM.  The x.W
        # projections do not depend on h, so the unrolled loop exposes them as
        # independent work to the scheduler.
        h = jnp.zeros(slab, jnp.float32)
        hs = []
        for t in range(n_steps):            # static unroll: his_num is small
            gi_r, gi_z, gi_n = b_r, b_z, b_in
            for d in range(msg_dim):
                x_td = x_ref[t * msg_dim + d, c].astype(jnp.float32)  # bf16 -> f32 (free filler)
                gi_r = gi_r + x_td * w_ih_ref[0 * msg_dim + d]
                gi_z = gi_z + x_td * w_ih_ref[1 * msg_dim + d]
                gi_n = gi_n + x_td * w_ih_ref[2 * msg_dim + d]
            r = jax.nn.sigmoid(gi_r + h * w_hh_ref[0])                # EUP
            z = jax.nn.sigmoid(gi_z + h * w_hh_ref[1])                # EUP
            n = jnp.tanh(gi_n + r * (h * w_hh_ref[2] + b_hn))         # EUP
            h = n + z * (h - n)                                       # == (1-z)*n + z*h
            hs.append(h)

        # ---- mk projection on the MXU ----
        # Stack the T hidden slabs (plus a ones slab for the bias) along the
        # sublane axis: rows t*8 + s.  W2[o*8+s, t*8+s'] = w_mk[o, t] * (s==s'),
        # W2[o*8+s, T*8+s'] = b_mk[o] * (s==s'), so W2 @ h_aug reproduces the
        # Linear while keeping the (sublane, lane) sequence packing intact.
        h_aug = jnp.concatenate(hs + [ones], axis=0)                  # (T*8+8, 128)

        for g0 in range(0, meta_dim, 16):                             # <=128-row result groups
            g1 = min(meta_dim, g0 + 16)
            mk = jnp.dot(w2_ref[g0 * 8:g1 * 8, :], h_aug,
                         preferred_element_type=jnp.float32)          # ((g1-g0)*8, 128)
            o_ref[g0:g1, c] = mk.reshape(g1 - g0, sub, cl)            # lane-dense store


def st_meta_learner_forward(x, params, *, max_lane_tile=8192,
                            input_dtype=jnp.bfloat16):
    """STMetaLearner.forward (tp=True, sp=False) on TPU via one fused Pallas kernel.

    x:      (B, N, his_num, message_dim) float32  == data.x
    params: dict with
        w_ih (3, message_dim), w_hh (3, 1) or (3,), b_ih (3,), b_hh (3,)  -- GRU (r, z, n)
        w_mk (meta_dim, his_num), b_mk (meta_dim,)                        -- mk_learner
    returns meta_knowledge (B, N, meta_dim) float32
    """
    B, N, T, D = x.shape
    meta = params["w_mk"].shape[0]
    S = B * N

    s_tile, n_tiles = _pick_tiling(S, max_lane_tile)
    s_pad = s_tile * n_tiles
    cps = s_tile // _CHUNK_SEQS                 # chunks per grid step
    n_chunks = s_pad // _CHUNK_SEQS

    # ---- single fused layout pass: cast (bf16) + pad + transpose ----
    x_flat = x.reshape(S, T * D).astype(input_dtype)       # cast BEFORE transpose: halves the pass
    if s_pad != S:
        x_flat = jnp.pad(x_flat, ((0, s_pad - S), (0, 0)))  # pre-transpose pad -> fuses
    x_tm = x_flat.T.reshape(T * D, n_chunks, 8, _CHUNK_LANES)

    # ---- weights ----
    w_ih = params["w_ih"].astype(jnp.float32).reshape(3 * D)          # flat SMEM
    w_hh = params["w_hh"].reshape(3).astype(jnp.float32)
    b_ih = params["b_ih"].astype(jnp.float32)
    b_hh = params["b_hh"].astype(jnp.float32)
    b_gates = jnp.stack([b_ih[0] + b_hh[0], b_ih[1] + b_hh[1], b_ih[2], b_hh[2]])

    w_mk = params["w_mk"].astype(jnp.float32)                          # (meta, T)
    b_mk = params["b_mk"].astype(jnp.float32)                          # (meta,)
    eye8 = jnp.eye(8, dtype=jnp.float32)
    w2 = (w_mk[:, None, :, None] * eye8[None, :, None, :]).reshape(meta * 8, T * 8)
    w2b = (b_mk[:, None, None] * eye8[None, :, :]).reshape(meta * 8, 8)
    w2_aug = jnp.concatenate([w2, w2b], axis=1)                        # (meta*8, T*8+8)

    smem = functools.partial(pl.BlockSpec, memory_space=pltpu.MemorySpace.SMEM)

    x_bytes = jnp.dtype(input_dtype).itemsize
    cost = pl.CostEstimate(
        flops=int(s_pad * (T * (6 * D + 20) + 2 * meta * (T + 1))),
        transcendentals=int(3 * s_pad * T),
        bytes_accessed=int(s_pad * T * D * x_bytes + s_pad * meta * 4),
    )

    out = pl.pallas_call(
        _st_meta_kernel,
        out_shape=jax.ShapeDtypeStruct((meta, n_chunks, 8, _CHUNK_LANES), jnp.float32),
        grid_spec=pltpu.PrefetchScalarGridSpec(
            num_scalar_prefetch=0,
            grid=(n_tiles,),
            in_specs=[
                # big lane-dense x tile: (T*D, cps, 8, 128) per grid step (bf16)
                pl.BlockSpec((T * D, cps, 8, _CHUNK_LANES), lambda i: (0, i, 0, 0)),
                # resident flat scalar weights/biases in SMEM
                smem(), smem(), smem(),
                # resident expanded mk weight in VMEM (MXU operand)
                pl.BlockSpec((meta * 8, T * 8 + 8), lambda i: (0, 0)),
            ],
            out_specs=pl.BlockSpec((meta, cps, 8, _CHUNK_LANES), lambda i: (0, i, 0, 0)),
        ),
        compiler_params=pltpu.CompilerParams(
            # multi-step parallel axis -> shards across v7x's 2 TensorCores
            dimension_semantics=("parallel",),
            # explicit budget; usage is a few MiB/step, safe on v7x's 64 MiB VMEM too
            vmem_limit_bytes=32 * 1024 * 1024,
        ),
        cost_estimate=cost,
    )(x_tm, w_ih, w_hh, b_gates, w2_aug)

    out = out.reshape(meta, s_pad)[:, :S]        # drop padding
    return out.T.reshape(B, N, meta)             # small final layout pass (see header note)


def _reference_forward(x, params):
    """Pure-JAX reference matching PyTorch GRU(hidden=1) + Linear semantics."""
    B, N, T, D = x.shape
    S = B * N
    w_ih = params["w_ih"]                       # (3, D), gate order (r, z, n)
    w_hh = params["w_hh"].reshape(3)            # (3,)
    b_ih, b_hh = params["b_ih"], params["b_hh"]
    w_mk, b_mk = params["w_mk"], params["b_mk"]

    xs = jnp.swapaxes(x.reshape(S, T, D), 0, 1)             # (T, S, D)

    def step(h, x_t):                                        # h (S,), x_t (S, D)
        gi = jnp.einsum("sd,gd->sg", x_t, w_ih,
                        precision=jax.lax.Precision.HIGHEST) + b_ih
        gh = h[:, None] * w_hh[None, :] + b_hh
        r = jax.nn.sigmoid(gi[:, 0] + gh[:, 0])
        z = jax.nn.sigmoid(gi[:, 1] + gh[:, 1])
        n = jnp.tanh(gi[:, 2] + r * gh[:, 2])
        h_new = (1.0 - z) * n + z * h
        return h_new, h_new

    _, hs = jax.lax.scan(step, jnp.zeros((S,), jnp.float32), xs)   # (T, S)
    tp_out = hs.T                                                   # (S, T)
    mk = jnp.einsum("st,mt->sm", tp_out, w_mk,
                    precision=jax.lax.Precision.HIGHEST) + b_mk
    return mk.reshape(B, N, -1)


if __name__ == "__main__":
    key = jax.random.PRNGKey(0)
    ks = jax.random.split(key, 8)

    # Small shapes consistent with the module's forward:
    #   batch_size=2, node_num=1000, his_num=8, message_dim=4, meta_dim=32
    # -> S = 2000 sequences: 2 parallel grid steps of 1024 (+ padding path).
    B, N, T, D, META = 2, 1000, 8, 4, 32

    x = jax.random.normal(ks[0], (B, N, T, D), dtype=jnp.float32)

    # Deterministic init mimicking PyTorch defaults
    # (GRU: U(+-1/sqrt(hidden)=+-1); Linear: U(+-1/sqrt(in_features))).
    gru_bound = 1.0
    lin_bound = 1.0 / (T ** 0.5)
    params = {
        "w_ih": jax.random.uniform(ks[1], (3, D), jnp.float32, -gru_bound, gru_bound),
        "w_hh": jax.random.uniform(ks[2], (3, 1), jnp.float32, -gru_bound, gru_bound),
        "b_ih": jax.random.uniform(ks[3], (3,), jnp.float32, -gru_bound, gru_bound),
        "b_hh": jax.random.uniform(ks[4], (3,), jnp.float32, -gru_bound, gru_bound),
        "w_mk": jax.random.uniform(ks[5], (META, T), jnp.float32, -lin_bound, lin_bound),
        "b_mk": jax.random.uniform(ks[6], (META,), jnp.float32, -lin_bound, lin_bound),
    }

    fwd = jax.jit(st_meta_learner_forward)
    y = jax.block_until_ready(fwd(x, params))

    # The kernel intentionally consumes bf16 inputs (perf feedback for v5e/v6e);
    # compare against the reference run on the same bf16-rounded x so the check
    # isolates kernel numerics (EUP transcendentals + f32 MXU mk projection).
    x_q = x.astype(jnp.bfloat16).astype(jnp.float32)
    y_ref = jax.block_until_ready(jax.jit(_reference_forward)(x_q, params))

    assert y.shape == (B, N, META), y.shape
    assert bool(jnp.all(jnp.isfinite(y)))
    max_err = float(jnp.max(jnp.abs(y - y_ref)))
    assert jnp.allclose(y, y_ref, atol=1e-3, rtol=1e-3), f"max abs err {max_err}"

    print("KERNEL_OK")
</pallas_src>

<mosaic_0001>
module attributes {stable_mosaic.version = 11 : i64} {
  func.func @_st_meta_kernel(%arg0: i32, %arg1: memref<32x1x8x128xbf16, #tpu.memory_space<vmem>>, %arg2: memref<12xf32, #tpu.memory_space<smem>>, %arg3: memref<3xf32, #tpu.memory_space<smem>>, %arg4: memref<4xf32, #tpu.memory_space<smem>>, %arg5: memref<256x72xf32, #tpu.memory_space<vmem>>, %arg6: memref<32x1x8x128xf32, #tpu.memory_space<vmem>>) attributes {dimension_semantics = [#tpu.dimension_semantics<parallel>], iteration_bounds = array<i64: 2>, scalar_prefetch = 0 : i64, scratch_operands = 0 : i64, tpu.core_type = #tpu.core_type<tc>, window_params = [{transform_indices = @transform_0, window_bounds = array<i64: 32, 1, 8, 128>}, {transform_indices = @transform_1, window_bounds = array<i64: 12>}, {transform_indices = @transform_2, window_bounds = array<i64: 3>}, {transform_indices = @transform_3, window_bounds = array<i64: 4>}, {pipeline_mode = #tpu.pipeline_mode<synchronous>, transform_indices = @transform_4, window_bounds = array<i64: 256, 72>}, {transform_indices = @transform_5, window_bounds = array<i64: 32, 1, 8, 128>}]} {
    %c0 = arith.constant 0 : index
    %0 = memref.load %arg4[%c0] : memref<4xf32, #tpu.memory_space<smem>>
    %1 = vector.broadcast %0 : f32 to vector<8x128xf32>
    %c1 = arith.constant 1 : index
    %2 = memref.load %arg4[%c1] : memref<4xf32, #tpu.memory_space<smem>>
    %3 = vector.broadcast %2 : f32 to vector<8x128xf32>
    %c2 = arith.constant 2 : index
    %4 = memref.load %arg4[%c2] : memref<4xf32, #tpu.memory_space<smem>>
    %5 = vector.broadcast %4 : f32 to vector<8x128xf32>
    %c3 = arith.constant 3 : index
    %6 = memref.load %arg4[%c3] : memref<4xf32, #tpu.memory_space<smem>>
    %7 = vector.broadcast %6 : f32 to vector<8x128xf32>
    %cst = arith.constant 1.000000e+00 : f32
    %8 = vector.broadcast %cst : f32 to vector<8x128xf32>
    %c0_i32 = arith.constant 0 : i32
    %c1_i32 = arith.constant 1 : i32
    %9 = arith.muli %c0_i32, %c1_i32 : i32
    %c0_i32_0 = arith.constant 0 : i32
    %10 = arith.addi %c0_i32_0, %9 : i32
    %cst_1 = arith.constant 0.000000e+00 : f32
    %11 = vector.broadcast %cst_1 : f32 to vector<8x128xf32>
    %c0_2 = arith.constant 0 : index
    %12 = arith.index_cast %10 : i32 to index
    %c0_3 = arith.constant 0 : index
    %c0_4 = arith.constant 0 : index
    %13 = vector.load %arg1[%c0_2, %12, %c0_3, %c0_4] : memref<32x1x8x128xbf16, #tpu.memory_space<vmem>>, vector<1x1x8x128xbf16>
    %14 = vector.shape_cast %13 : vector<1x1x8x128xbf16> to vector<8x128xbf16>
    %15 = arith.extf %14 : vector<8x128xbf16> to vector<8x128xf32>
    %c0_5 = arith.constant 0 : index
    %16 = memref.load %arg2[%c0_5] : memref<12xf32, #tpu.memory_space<smem>>
    %17 = vector.broadcast %16 : f32 to vector<8x128xf32>
    %18 = arith.mulf %15, %17 : vector<8x128xf32>
    %19 = arith.addf %1, %18 : vector<8x128xf32>
    %c4 = arith.constant 4 : index
    %20 = memref.load %arg2[%c4] : memref<12xf32, #tpu.memory_space<smem>>
    %21 = vector.broadcast %20 : f32 to vector<8x128xf32>
    %22 = arith.mulf %15, %21 : vector<8x128xf32>
    %23 = arith.addf %3, %22 : vector<8x128xf32>
    %c8 = arith.constant 8 : index
    %24 = memref.load %arg2[%c8] : memref<12xf32, #tpu.memory_space<smem>>
    %25 = vector.broadcast %24 : f32 to vector<8x128xf32>
    %26 = arith.mulf %15, %25 : vector<8x128xf32>
    %27 = arith.addf %5, %26 : vector<8x128xf32>
    %c1_6 = arith.constant 1 : index
    %28 = arith.index_cast %10 : i32 to index
    %c0_7 = arith.constant 0 : index
    %c0_8 = arith.constant 0 : index
    %29 = vector.load %arg1[%c1_6, %28, %c0_7, %c0_8] : memref<32x1x8x128xbf16, #tpu.memory_space<vmem>>, vector<1x1x8x128xbf16>
    %30 = vector.shape_cast %29 : vector<1x1x8x128xbf16> to vector<8x128xbf16>
    %31 = arith.extf %30 : vector<8x128xbf16> to vector<8x128xf32>
    %c1_9 = arith.constant 1 : index
    %32 = memref.load %arg2[%c1_9] : memref<12xf32, #tpu.memory_space<smem>>
    %33 = vector.broadcast %32 : f32 to vector<8x128xf32>
    %34 = arith.mulf %31, %33 : vector<8x128xf32>
    %35 = arith.addf %19, %34 : vector<8x128xf32>
    %c5 = arith.constant 5 : index
    %36 = memref.load %arg2[%c5] : memref<12xf32, #tpu.memory_space<smem>>
    %37 = vector.broadcast %36 : f32 to vector<8x128xf32>
    %38 = arith.mulf %31, %37 : vector<8x128xf32>
    %39 = arith.addf %23, %38 : vector<8x128xf32>
    %c9 = arith.constant 9 : index
    %40 = memref.load %arg2[%c9] : memref<12xf32, #tpu.memory_space<smem>>
    %41 = vector.broadcast %40 : f32 to vector<8x128xf32>
    %42 = arith.mulf %31, %41 : vector<8x128xf32>
    %43 = arith.addf %27, %42 : vector<8x128xf32>
    %c2_10 = arith.constant 2 : index
    %44 = arith.index_cast %10 : i32 to index
    %c0_11 = arith.constant 0 : index
    %c0_12 = arith.constant 0 : index
    %45 = vector.load %arg1[%c2_10, %44, %c0_11, %c0_12] : memref<32x1x8x128xbf16, #tpu.memory_space<vmem>>, vector<1x1x8x128xbf16>
    %46 = vector.shape_cast %45 : vector<1x1x8x128xbf16> to vector<8x128xbf16>
    %47 = arith.extf %46 : vector<8x128xbf16> to vector<8x128xf32>
    %c2_13 = arith.constant 2 : index
    %48 = memref.load %arg2[%c2_13] : memref<12xf32, #tpu.memory_space<smem>>
    %49 = vector.broadcast %48 : f32 to vector<8x128xf32>
    %50 = arith.mulf %47, %49 : vector<8x128xf32>
    %51 = arith.addf %35, %50 : vector<8x128xf32>
    %c6 = arith.constant 6 : index
    %52 = memref.load %arg2[%c6] : memref<12xf32, #tpu.memory_space<smem>>
    %53 = vector.broadcast %52 : f32 to vector<8x128xf32>
    %54 = arith.mulf %47, %53 : vector<8x128xf32>
    %55 = arith.addf %39, %54 : vector<8x128xf32>
    %c10 = arith.constant 10 : index
    %56 = memref.load %arg2[%c10] : memref<12xf32, #tpu.memory_space<smem>>
    %57 = vector.broadcast %56 : f32 to vector<8x128xf32>
    %58 = arith.mulf %47, %57 : vector<8x128xf32>
    %59 = arith.addf %43, %58 : vector<8x128xf32>
    %c3_14 = arith.constant 3 : index
    %60 = arith.index_cast %10 : i32 to index
    %c0_15 = arith.constant 0 : index
    %c0_16 = arith.constant 0 : index
    %61 = vector.load %arg1[%c3_14, %60, %c0_15, %c0_16] : memref<32x1x8x128xbf16, #tpu.memory_space<vmem>>, vector<1x1x8x128xbf16>
    %62 = vector.shape_cast %61 : vector<1x1x8x128xbf16> to vector<8x128xbf16>
    %63 = arith.extf %62 : vector<8x128xbf16> to vector<8x128xf32>
    %c3_17 = arith.constant 3 : index
    %64 = memref.load %arg2[%c3_17] : memref<12xf32, #tpu.memory_space<smem>>
    %65 = vector.broadcast %64 : f32 to vector<8x128xf32>
    %66 = arith.mulf %63, %65 : vector<8x128xf32>
    %67 = arith.addf %51, %66 : vector<8x128xf32>
    %c7 = arith.constant 7 : index
    %68 = memref.load %arg2[%c7] : memref<12xf32, #tpu.memory_space<smem>>
    %69 = vector.broadcast %68 : f32 to vector<8x128xf32>
    %70 = arith.mulf %63, %69 : vector<8x128xf32>
    %71 = arith.addf %55, %70 : vector<8x128xf32>
    %c11 = arith.constant 11 : index
    %72 = memref.load %arg2[%c11] : memref<12xf32, #tpu.memory_space<smem>>
    %73 = vector.broadcast %72 : f32 to vector<8x128xf32>
    %74 = arith.mulf %63, %73 : vector<8x128xf32>
    %75 = arith.addf %59, %74 : vector<8x128xf32>
    %c0_18 = arith.constant 0 : index
    %76 = memref.load %arg3[%c0_18] : memref<3xf32, #tpu.memory_space<smem>>
    %77 = vector.broadcast %76 : f32 to vector<8x128xf32>
    %78 = arith.mulf %11, %77 : vector<8x128xf32>
    %79 = arith.addf %67, %78 : vector<8x128xf32>
    %80 = arith.negf %79 : vector<8x128xf32>
    %81 = math.exp %80 : vector<8x128xf32>
    %cst_19 = arith.constant 1.000000e+00 : f32
    %82 = vector.broadcast %cst_19 : f32 to vector<8x128xf32>
    %83 = arith.addf %82, %81 : vector<8x128xf32>
    %84 = arith.divf %82, %83 : vector<8x128xf32>
    %c1_20 = arith.constant 1 : index
    %85 = memref.load %arg3[%c1_20] : memref<3xf32, #tpu.memory_space<smem>>
    %86 = vector.broadcast %85 : f32 to vector<8x128xf32>
    %87 = arith.mulf %11, %86 : vector<8x128xf32>
    %88 = arith.addf %71, %87 : vector<8x128xf32>
    %89 = arith.negf %88 : vector<8x128xf32>
    %90 = math.exp %89 : vector<8x128xf32>
    %cst_21 = arith.constant 1.000000e+00 : f32
    %91 = vector.broadcast %cst_21 : f32 to vector<8x128xf32>
    %92 = arith.addf %91, %90 : vector<8x128xf32>
    %93 = arith.divf %91, %92 : vector<8x128xf32>
    %c2_22 = arith.constant 2 : index
    %94 = memref.load %arg3[%c2_22] : memref<3xf32, #tpu.memory_space<smem>>
    %95 = vector.broadcast %94 : f32 to vector<8x128xf32>
    %96 = arith.mulf %11, %95 : vector<8x128xf32>
    %97 = arith.addf %96, %7 : vector<8x128xf32>
    %98 = arith.mulf %84, %97 : vector<8x128xf32>
    %99 = arith.addf %75, %98 : vector<8x128xf32>
    %100 = math.tanh %99 : vector<8x128xf32>
    %101 = arith.subf %11, %100 : vector<8x128xf32>
    %102 = arith.mulf %93, %101 : vector<8x128xf32>
    %103 = arith.addf %100, %102 : vector<8x128xf32>
    %c4_23 = arith.constant 4 : index
    %104 = arith.index_cast %10 : i32 to index
    %c0_24 = arith.constant 0 : index
    %c0_25 = arith.constant 0 : index
    %105 = vector.load %arg1[%c4_23, %104, %c0_24, %c0_25] : memref<32x1x8x128xbf16, #tpu.memory_space<vmem>>, vector<1x1x8x128xbf16>
    %106 = vector.shape_cast %105 : vector<1x1x8x128xbf16> to vector<8x128xbf16>
    %107 = arith.extf %106 : vector<8x128xbf16> to vector<8x128xf32>
    %c0_26 = arith.constant 0 : index
    %108 = memref.load %arg2[%c0_26] : memref<12xf32, #tpu.memory_space<smem>>
    %109 = vector.broadcast %108 : f32 to vector<8x128xf32>
    %110 = arith.mulf %107, %109 : vector<8x128xf32>
    %111 = arith.addf %1, %110 : vector<8x128xf32>
    %c4_27 = arith.constant 4 : index
    %112 = memref.load %arg2[%c4_27] : memref<12xf32, #tpu.memory_space<smem>>
    %113 = vector.broadcast %112 : f32 to vector<8x128xf32>
    %114 = arith.mulf %107, %113 : vector<8x128xf32>
    %115 = arith.addf %3, %114 : vector<8x128xf32>
    %c8_28 = arith.constant 8 : index
    %116 = memref.load %arg2[%c8_28] : memref<12xf32, #tpu.memory_space<smem>>
    %117 = vector.broadcast %116 : f32 to vector<8x128xf32>
    %118 = arith.mulf %107, %117 : vector<8x128xf32>
    %119 = arith.addf %5, %118 : vector<8x128xf32>
    %c5_29 = arith.constant 5 : index
    %120 = arith.index_cast %10 : i32 to index
    %c0_30 = arith.constant 0 : index
    %c0_31 = arith.constant 0 : index
    %121 = vector.load %arg1[%c5_29, %120, %c0_30, %c0_31] : memref<32x1x8x128xbf16, #tpu.memory_space<vmem>>, vector<1x1x8x128xbf16>
    %122 = vector.shape_cast %121 : vector<1x1x8x128xbf16> to vector<8x128xbf16>
    %123 = arith.extf %122 : vector<8x128xbf16> to vector<8x128xf32>
    %c1_32 = arith.constant 1 : index
    %124 = memref.load %arg2[%c1_32] : memref<12xf32, #tpu.memory_space<smem>>
    %125 = vector.broadcast %124 : f32 to vector<8x128xf32>
    %126 = arith.mulf %123, %125 : vector<8x128xf32>
    %127 = arith.addf %111, %126 : vector<8x128xf32>
    %c5_33 = arith.constant 5 : index
    %128 = memref.load %arg2[%c5_33] : memref<12xf32, #tpu.memory_space<smem>>
    %129 = vector.broadcast %128 : f32 to vector<8x128xf32>
    %130 = arith.mulf %123, %129 : vector<8x128xf32>
    %131 = arith.addf %115, %130 : vector<8x128xf32>
    %c9_34 = arith.constant 9 : index
    %132 = memref.load %arg2[%c9_34] : memref<12xf32, #tpu.memory_space<smem>>
    %133 = vector.broadcast %132 : f32 to vector<8x128xf32>
    %134 = arith.mulf %123, %133 : vector<8x128xf32>
    %135 = arith.addf %119, %134 : vector<8x128xf32>
    %c6_35 = arith.constant 6 : index
    %136 = arith.index_cast %10 : i32 to index
    %c0_36 = arith.constant 0 : index
    %c0_37 = arith.constant 0 : index
    %137 = vector.load %arg1[%c6_35, %136, %c0_36, %c0_37] : memref<32x1x8x128xbf16, #tpu.memory_space<vmem>>, vector<1x1x8x128xbf16>
    %138 = vector.shape_cast %137 : vector<1x1x8x128xbf16> to vector<8x128xbf16>
    %139 = arith.extf %138 : vector<8x128xbf16> to vector<8x128xf32>
    %c2_38 = arith.constant 2 : index
    %140 = memref.load %arg2[%c2_38] : memref<12xf32, #tpu.memory_space<smem>>
    %141 = vector.broadcast %140 : f32 to vector<8x128xf32>
    %142 = arith.mulf %139, %141 : vector<8x128xf32>
    %143 = arith.addf %127, %142 : vector<8x128xf32>
    %c6_39 = arith.constant 6 : index
    %144 = memref.load %arg2[%c6_39] : memref<12xf32, #tpu.memory_space<smem>>
    %145 = vector.broadcast %144 : f32 to vector<8x128xf32>
    %146 = arith.mulf %139, %145 : vector<8x128xf32>
    %147 = arith.addf %131, %146 : vector<8x128xf32>
    %c10_40 = arith.constant 10 : index
    %148 = memref.load %arg2[%c10_40] : memref<12xf32, #tpu.memory_space<smem>>
    %149 = vector.broadcast %148 : f32 to vector<8x128xf32>
    %150 = arith.mulf %139, %149 : vector<8x128xf32>
    %151 = arith.addf %135, %150 : vector<8x128xf32>
    %c7_41 = arith.constant 7 : index
    %152 = arith.index_cast %10 : i32 to index
    %c0_42 = arith.constant 0 : index
    %c0_43 = arith.constant 0 : index
    %153 = vector.load %arg1[%c7_41, %152, %c0_42, %c0_43] : memref<32x1x8x128xbf16, #tpu.memory_space<vmem>>, vector<1x1x8x128xbf16>
    %154 = vector.shape_cast %153 : vector<1x1x8x128xbf16> to vector<8x128xbf16>
    %155 = arith.extf %154 : vector<8x128xbf16> to vector<8x128xf32>
    %c3_44 = arith.constant 3 : index
    %156 = memref.load %arg2[%c3_44] : memref<12xf32, #tpu.memory_space<smem>>
    %157 = vector.broadcast %156 : f32 to vector<8x128xf32>
    %158 = arith.mulf %155, %157 : vector<8x128xf32>
    %159 = arith.addf %143, %158 : vector<8x128xf32>
    %c7_45 = arith.constant 7 : index
    %160 = memref.load %arg2[%c7_45] : memref<12xf32, #tpu.memory_space<smem>>
    %161 = vector.broadcast %160 : f32 to vector<8x128xf32>
    %162 = arith.mulf %155, %161 : vector<8x128xf32>
    %163 = arith.addf %147, %162 : vector<8x128xf32>
    %c11_46 = arith.constant 11 : index
    %164 = memref.load %arg2[%c11_46] : memref<12xf32, #tpu.memory_space<smem>>
    %165 = vector.broadcast %164 : f32 to vector<8x128xf32>
    %166 = arith.mulf %155, %165 : vector<8x128xf32>
    %167 = arith.addf %151, %166 : vector<8x128xf32>
    %c0_47 = arith.constant 0 : index
    %168 = memref.load %arg3[%c0_47] : memref<3xf32, #tpu.memory_space<smem>>
    %169 = vector.broadcast %168 : f32 to vector<8x128xf32>
    %170 = arith.mulf %103, %169 : vector<8x128xf32>
    %171 = arith.addf %159, %170 : vector<8x128xf32>
    %172 = arith.negf %171 : vector<8x128xf32>
    %173 = math.exp %172 : vector<8x128xf32>
    %cst_48 = arith.constant 1.000000e+00 : f32
    %174 = vector.broadcast %cst_48 : f32 to vector<8x128xf32>
    %175 = arith.addf %174, %173 : vector<8x128xf32>
    %176 = arith.divf %174, %175 : vector<8x128xf32>
    %c1_49 = arith.constant 1 : index
    %177 = memref.load %arg3[%c1_49] : memref<3xf32, #tpu.memory_space<smem>>
    %178 = vector.broadcast %177 : f32 to vector<8x128xf32>
    %179 = arith.mulf %103, %178 : vector<8x128xf32>
    %180 = arith.addf %163, %179 : vector<8x128xf32>
    %181 = arith.negf %180 : vector<8x128xf32>
    %182 = math.exp %181 : vector<8x128xf32>
    %cst_50 = arith.constant 1.000000e+00 : f32
    %183 = vector.broadcast %cst_50 : f32 to vector<8x128xf32>
    %184 = arith.addf %183, %182 : vector<8x128xf32>
    %185 = arith.divf %183, %184 : vector<8x128xf32>
    %c2_51 = arith.constant 2 : index
    %186 = memref.load %arg3[%c2_51] : memref<3xf32, #tpu.memory_space<smem>>
    %187 = vector.broadcast %186 : f32 to vector<8x128xf32>
    %188 = arith.mulf %103, %187 : vector<8x128xf32>
    %189 = arith.addf %188, %7 : vector<8x128xf32>
    %190 = arith.mulf %176, %189 : vector<8x128xf32>
    %191 = arith.addf %167, %190 : vector<8x128xf32>
    %192 = math.tanh %191 : vector<8x128xf32>
    %193 = arith.subf %103, %192 : vector<8x128xf32>
    %194 = arith.mulf %185, %193 : vector<8x128xf32>
    %195 = arith.addf %192, %194 : vector<8x128xf32>
    %c8_52 = arith.constant 8 : index
    %196 = arith.index_cast %10 : i32 to index
    %c0_53 = arith.constant 0 : index
    %c0_54 = arith.constant 0 : index
    %197 = vector.load %arg1[%c8_52, %196, %c0_53, %c0_54] : memref<32x1x8x128xbf16, #tpu.memory_space<vmem>>, vector<1x1x8x128xbf16>
    %198 = vector.shape_cast %197 : vector<1x1x8x128xbf16> to vector<8x128xbf16>
    %199 = arith.extf %198 : vector<8x128xbf16> to vector<8x128xf32>
    %c0_55 = arith.constant 0 : index
    %200 = memref.load %arg2[%c0_55] : memref<12xf32, #tpu.memory_space<smem>>
    %201 = vector.broadcast %200 : f32 to vector<8x128xf32>
    %202 = arith.mulf %199, %201 : vector<8x128xf32>
    %203 = arith.addf %1, %202 : vector<8x128xf32>
    %c4_56 = arith.constant 4 : index
    %204 = memref.load %arg2[%c4_56] : memref<12xf32, #tpu.memory_space<smem>>
    %205 = vector.broadcast %204 : f32 to vector<8x128xf32>
    %206 = arith.mulf %199, %205 : vector<8x128xf32>
    %207 = arith.addf %3, %206 : vector<8x128xf32>
    %c8_57 = arith.constant 8 : index
    %208 = memref.load %arg2[%c8_57] : memref<12xf32, #tpu.memory_space<smem>>
    %209 = vector.broadcast %208 : f32 to vector<8x128xf32>
    %210 = arith.mulf %199, %209 : vector<8x128xf32>
    %211 = arith.addf %5, %210 : vector<8x128xf32>
    %c9_58 = arith.constant 9 : index
    %212 = arith.index_cast %10 : i32 to index
    %c0_59 = arith.constant 0 : index
    %c0_60 = arith.constant 0 : index
    %213 = vector.load %arg1[%c9_58, %212, %c0_59, %c0_60] : memref<32x1x8x128xbf16, #tpu.memory_space<vmem>>, vector<1x1x8x128xbf16>
    %214 = vector.shape_cast %213 : vector<1x1x8x128xbf16> to vector<8x128xbf16>
    %215 = arith.extf %214 : vector<8x128xbf16> to vector<8x128xf32>
    %c1_61 = arith.constant 1 : index
    %216 = memref.load %arg2[%c1_61] : memref<12xf32, #tpu.memory_space<smem>>
    %217 = vector.broadcast %216 : f32 to vector<8x128xf32>
    %218 = arith.mulf %215, %217 : vector<8x128xf32>
    %219 = arith.addf %203, %218 : vector<8x128xf32>
    %c5_62 = arith.constant 5 : index
    %220 = memref.load %arg2[%c5_62] : memref<12xf32, #tpu.memory_space<smem>>
    %221 = vector.broadcast %220 : f32 to vector<8x128xf32>
    %222 = arith.mulf %215, %221 : vector<8x128xf32>
    %223 = arith.addf %207, %222 : vector<8x128xf32>
    %c9_63 = arith.constant 9 : index
    %224 = memref.load %arg2[%c9_63] : memref<12xf32, #tpu.memory_space<smem>>
    %225 = vector.broadcast %224 : f32 to vector<8x128xf32>
    %226 = arith.mulf %215, %225 : vector<8x128xf32>
    %227 = arith.addf %211, %226 : vector<8x128xf32>
    %c10_64 = arith.constant 10 : index
    %228 = arith.index_cast %10 : i32 to index
    %c0_65 = arith.constant 0 : index
    %c0_66 = arith.constant 0 : index
    %229 = vector.load %arg1[%c10_64, %228, %c0_65, %c0_66] : memref<32x1x8x128xbf16, #tpu.memory_space<vmem>>, vector<1x1x8x128xbf16>
    %230 = vector.shape_cast %229 : vector<1x1x8x128xbf16> to vector<8x128xbf16>
    %231 = arith.extf %230 : vector<8x128xbf16> to vector<8x128xf32>
    %c2_67 = arith.constant 2 : index
    %232 = memref.load %arg2[%c2_67] : memref<12xf32, #tpu.memory_space<smem>>
    %233 = vector.broadcast %232 : f32 to vector<8x128xf32>
    %234 = arith.mulf %231, %233 : vector<8x128xf32>
    %235 = arith.addf %219, %234 : vector<8x128xf32>
    %c6_68 = arith.constant 6 : index
    %236 = memref.load %arg2[%c6_68] : memref<12xf32, #tpu.memory_space<smem>>
    %237 = vector.broadcast %236 : f32 to vector<8x128xf32>
    %238 = arith.mulf %231, %237 : vector<8x128xf32>
    %239 = arith.addf %223, %238 : vector<8x128xf32>
    %c10_69 = arith.constant 10 : index
    %240 = memref.load %arg2[%c10_69] : memref<12xf32, #tpu.memory_space<smem>>
    %241 = vector.broadcast %240 : f32 to vector<8x128xf32>
    %242 = arith.mulf %231, %241 : vector<8x128xf32>
    %243 = arith.addf %227, %242 : vector<8x128xf32>
    %c11_70 = arith.constant 11 : index
    %244 = arith.index_cast %10 : i32 to index
    %c0_71 = arith.constant 0 : index
    %c0_72 = arith.constant 0 : index
    %245 = vector.load %arg1[%c11_70, %244, %c0_71, %c0_72] : memref<32x1x8x128xbf16, #tpu.memory_space<vmem>>, vector<1x1x8x128xbf16>
    %246 = vector.shape_cast %245 : vector<1x1x8x128xbf16> to vector<8x128xbf16>
    %247 = arith.extf %246 : vector<8x128xbf16> to vector<8x128xf32>
    %c3_73 = arith.constant 3 : index
    %248 = memref.load %arg2[%c3_73] : memref<12xf32, #tpu.memory_space<smem>>
    %249 = vector.broadcast %248 : f32 to vector<8x128xf32>
    %250 = arith.mulf %247, %249 : vector<8x128xf32>
    %251 = arith.addf %235, %250 : vector<8x128xf32>
    %c7_74 = arith.constant 7 : index
    %252 = memref.load %arg2[%c7_74] : memref<12xf32, #tpu.memory_space<smem>>
    %253 = vector.broadcast %252 : f32 to vector<8x128xf32>
    %254 = arith.mulf %247, %253 : vector<8x128xf32>
    %255 = arith.addf %239, %254 : vector<8x128xf32>
    %c11_75 = arith.constant 11 : index
    %256 = memref.load %arg2[%c11_75] : memref<12xf32, #tpu.memory_space<smem>>
    %257 = vector.broadcast %256 : f32 to vector<8x128xf32>
    %258 = arith.mulf %247, %257 : vector<8x128xf32>
    %259 = arith.addf %243, %258 : vector<8x128xf32>
    %c0_76 = arith.constant 0 : index
    %260 = memref.load %arg3[%c0_76] : memref<3xf32, #tpu.memory_space<smem>>
    %261 = vector.broadcast %260 : f32 to vector<8x128xf32>
    %262 = arith.mulf %195, %261 : vector<8x128xf32>
    %263 = arith.addf %251, %262 : vector<8x128xf32>
    %264 = arith.negf %263 : vector<8x128xf32>
    %265 = math.exp %264 : vector<8x128xf32>
    %cst_77 = arith.constant 1.000000e+00 : f32
    %266 = vector.broadcast %cst_77 : f32 to vector<8x128xf32>
    %267 = arith.addf %266, %265 : vector<8x128xf32>
    %268 = arith.divf %266, %267 : vector<8x128xf32>
    %c1_78 = arith.constant 1 : index
    %269 = memref.load %arg3[%c1_78] : memref<3xf32, #tpu.memory_space<smem>>
    %270 = vector.broadcast %269 : f32 to vector<8x128xf32>
    %271 = arith.mulf %195, %270 : vector<8x128xf32>
    %272 = arith.addf %255, %271 : vector<8x128xf32>
    %273 = arith.negf %272 : vector<8x128xf32>
    %274 = math.exp %273 : vector<8x128xf32>
    %cst_79 = arith.constant 1.000000e+00 : f32
    %275 = vector.broadcast %cst_79 : f32 to vector<8x128xf32>
    %276 = arith.addf %275, %274 : vector<8x128xf32>
    %277 = arith.divf %275, %276 : vector<8x128xf32>
    %c2_80 = arith.constant 2 : index
    %278 = memref.load %arg3[%c2_80] : memref<3xf32, #tpu.memory_space<smem>>
    %279 = vector.broadcast %278 : f32 to vector<8x128xf32>
    %280 = arith.mulf %195, %279 : vector<8x128xf32>
    %281 = arith.addf %280, %7 : vector<8x128xf32>
    %282 = arith.mulf %268, %281 : vector<8x128xf32>
    %283 = arith.addf %259, %282 : vector<8x128xf32>
    %284 = math.tanh %283 : vector<8x128xf32>
    %285 = arith.subf %195, %284 : vector<8x128xf32>
    %286 = arith.mulf %277, %285 : vector<8x128xf32>
    %287 = arith.addf %284, %286 : vector<8x128xf32>
    %c12 = arith.constant 12 : index
    %288 = arith.index_cast %10 : i32 to index
    %c0_81 = arith.constant 0 : index
    %c0_82 = arith.constant 0 : index
    %289 = vector.load %arg1[%c12, %288, %c0_81, %c0_82] : memref<32x1x8x128xbf16, #tpu.memory_space<vmem>>, vector<1x1x8x128xbf16>
    %290 = vector.shape_cast %289 : vector<1x1x8x128xbf16> to vector<8x128xbf16>
    %291 = arith.extf %290 : vector<8x128xbf16> to vector<8x128xf32>
    %c0_83 = arith.constant 0 : index
    %292 = memref.load %arg2[%c0_83] : memref<12xf32, #tpu.memory_space<smem>>
    %293 = vector.broadcast %292 : f32 to vector<8x128xf32>
    %294 = arith.mulf %291, %293 : vector<8x128xf32>
    %295 = arith.addf %1, %294 : vector<8x128xf32>
    %c4_84 = arith.constant 4 : index
    %296 = memref.load %arg2[%c4_84] : memref<12xf32, #tpu.memory_space<smem>>
    %297 = vector.broadcast %296 : f32 to vector<8x128xf32>
    %298 = arith.mulf %291, %297 : vector<8x128xf32>
    %299 = arith.addf %3, %298 : vector<8x128xf32>
    %c8_85 = arith.constant 8 : index
    %300 = memref.load %arg2[%c8_85] : memref<12xf32, #tpu.memory_space<smem>>
    %301 = vector.broadcast %300 : f32 to vector<8x128xf32>
    %302 = arith.mulf %291, %301 : vector<8x128xf32>
    %303 = arith.addf %5, %302 : vector<8x128xf32>
    %c13 = arith.constant 13 : index
    %304 = arith.index_cast %10 : i32 to index
    %c0_86 = arith.constant 0 : index
    %c0_87 = arith.constant 0 : index
    %305 = vector.load %arg1[%c13, %304, %c0_86, %c0_87] : memref<32x1x8x128xbf16, #tpu.memory_space<vmem>>, vector<1x1x8x128xbf16>
    %306 = vector.shape_cast %305 : vector<1x1x8x128xbf16> to vector<8x128xbf16>
    %307 = arith.extf %306 : vector<8x128xbf16> to vector<8x128xf32>
    %c1_88 = arith.constant 1 : index
    %308 = memref.load %arg2[%c1_88] : memref<12xf32, #tpu.memory_space<smem>>
    %309 = vector.broadcast %308 : f32 to vector<8x128xf32>
    %310 = arith.mulf %307, %309 : vector<8x128xf32>
    %311 = arith.addf %295, %310 : vector<8x128xf32>
    %c5_89 = arith.constant 5 : index
    %312 = memref.load %arg2[%c5_89] : memref<12xf32, #tpu.memory_space<smem>>
    %313 = vector.broadcast %312 : f32 to vector<8x128xf32>
    %314 = arith.mulf %307, %313 : vector<8x128xf32>
    %315 = arith.addf %299, %314 : vector<8x128xf32>
    %c9_90 = arith.constant 9 : index
    %316 = memref.load %arg2[%c9_90] : memref<12xf32, #tpu.memory_space<smem>>
    %317 = vector.broadcast %316 : f32 to vector<8x128xf32>
    %318 = arith.mulf %307, %317 : vector<8x128xf32>
    %319 = arith.addf %303, %318 : vector<8x128xf32>
    %c14 = arith.constant 14 : index
    %320 = arith.index_cast %10 : i32 to index
    %c0_91 = arith.constant 0 : index
    %c0_92 = arith.constant 0 : index
    %321 = vector.load %arg1[%c14, %320, %c0_91, %c0_92] : memref<32x1x8x128xbf16, #tpu.memory_space<vmem>>, vector<1x1x8x128xbf16>
    %322 = vector.shape_cast %321 : vector<1x1x8x128xbf16> to vector<8x128xbf16>
    %323 = arith.extf %322 : vector<8x128xbf16> to vector<8x128xf32>
    %c2_93 = arith.constant 2 : index
    %324 = memref.load %arg2[%c2_93] : memref<12xf32, #tpu.memory_space<smem>>
    %325 = vector.broadcast %324 : f32 to vector<8x128xf32>
    %326 = arith.mulf %323, %325 : vector<8x128xf32>
    %327 = arith.addf %311, %326 : vector<8x128xf32>
    %c6_94 = arith.constant 6 : index
    %328 = memref.load %arg2[%c6_94] : memref<12xf32, #tpu.memory_space<smem>>
    %329 = vector.broadcast %328 : f32 to vector<8x128xf32>
    %330 = arith.mulf %323, %329 : vector<8x128xf32>
    %331 = arith.addf %315, %330 : vector<8x128xf32>
    %c10_95 = arith.constant 10 : index
    %332 = memref.load %arg2[%c10_95] : memref<12xf32, #tpu.memory_space<smem>>
    %333 = vector.broadcast %332 : f32 to vector<8x128xf32>
    %334 = arith.mulf %323, %333 : vector<8x128xf32>
    %335 = arith.addf %319, %334 : vector<8x128xf32>
    %c15 = arith.constant 15 : index
    %336 = arith.index_cast %10 : i32 to index
    %c0_96 = arith.constant 0 : index
    %c0_97 = arith.constant 0 : index
    %337 = vector.load %arg1[%c15, %336, %c0_96, %c0_97] : memref<32x1x8x128xbf16, #tpu.memory_space<vmem>>, vector<1x1x8x128xbf16>
    %338 = vector.shape_cast %337 : vector<1x1x8x128xbf16> to vector<8x128xbf16>
    %339 = arith.extf %338 : vector<8x128xbf16> to vector<8x128xf32>
    %c3_98 = arith.constant 3 : index
    %340 = memref.load %arg2[%c3_98] : memref<12xf32, #tpu.memory_space<smem>>
    %341 = vector.broadcast %340 : f32 to vector<8x128xf32>
    %342 = arith.mulf %339, %341 : vector<8x128xf32>
    %343 = arith.addf %327, %342 : vector<8x128xf32>
    %c7_99 = arith.constant 7 : index
    %344 = memref.load %arg2[%c7_99] : memref<12xf32, #tpu.memory_space<smem>>
    %345 = vector.broadcast %344 : f32 to vector<8x128xf32>
    %346 = arith.mulf %339, %345 : vector<8x128xf32>
    %347 = arith.addf %331, %346 : vector<8x128xf32>
    %c11_100 = arith.constant 11 : index
    %348 = memref.load %arg2[%c11_100] : memref<12xf32, #tpu.memory_space<smem>>
    %349 = vector.broadcast %348 : f32 to vector<8x128xf32>
    %350 = arith.mulf %339, %349 : vector<8x128xf32>
    %351 = arith.addf %335, %350 : vector<8x128xf32>
    %c0_101 = arith.constant 0 : index
    %352 = memref.load %arg3[%c0_101] : memref<3xf32, #tpu.memory_space<smem>>
    %353 = vector.broadcast %352 : f32 to vector<8x128xf32>
    %354 = arith.mulf %287, %353 : vector<8x128xf32>
    %355 = arith.addf %343, %354 : vector<8x128xf32>
    %356 = arith.negf %355 : vector<8x128xf32>
    %357 = math.exp %356 : vector<8x128xf32>
    %cst_102 = arith.constant 1.000000e+00 : f32
    %358 = vector.broadcast %cst_102 : f32 to vector<8x128xf32>
    %359 = arith.addf %358, %357 : vector<8x128xf32>
    %360 = arith.divf %358, %359 : vector<8x128xf32>
    %c1_103 = arith.constant 1 : index
    %361 = memref.load %arg3[%c1_103] : memref<3xf32, #tpu.memory_space<smem>>
    %362 = vector.broadcast %361 : f32 to vector<8x128xf32>
    %363 = arith.mulf %287, %362 : vector<8x128xf32>
    %364 = arith.addf %347, %363 : vector<8x128xf32>
    %365 = arith.negf %364 : vector<8x128xf32>
    %366 = math.exp %365 : vector<8x128xf32>
    %cst_104 = arith.constant 1.000000e+00 : f32
    %367 = vector.broadcast %cst_104 : f32 to vector<8x128xf32>
    %368 = arith.addf %367, %366 : vector<8x128xf32>
    %369 = arith.divf %367, %368 : vector<8x128xf32>
    %c2_105 = arith.constant 2 : index
    %370 = memref.load %arg3[%c2_105] : memref<3xf32, #tpu.memory_space<smem>>
    %371 = vector.broadcast %370 : f32 to vector<8x128xf32>
    %372 = arith.mulf %287, %371 : vector<8x128xf32>
    %373 = arith.addf %372, %7 : vector<8x128xf32>
    %374 = arith.mulf %360, %373 : vector<8x128xf32>
    %375 = arith.addf %351, %374 : vector<8x128xf32>
    %376 = math.tanh %375 : vector<8x128xf32>
    %377 = arith.subf %287, %376 : vector<8x128xf32>
    %378 = arith.mulf %369, %377 : vector<8x128xf32>
    %379 = arith.addf %376, %378 : vector<8x128xf32>
    %c16 = arith.constant 16 : index
    %380 = arith.index_cast %10 : i32 to index
    %c0_106 = arith.constant 0 : index
    %c0_107 = arith.constant 0 : index
    %381 = vector.load %arg1[%c16, %380, %c0_106, %c0_107] : memref<32x1x8x128xbf16, #tpu.memory_space<vmem>>, vector<1x1x8x128xbf16>
    %382 = vector.shape_cast %381 : vector<1x1x8x128xbf16> to vector<8x128xbf16>
    %383 = arith.extf %382 : vector<8x128xbf16> to vector<8x128xf32>
    %c0_108 = arith.constant 0 : index
    %384 = memref.load %arg2[%c0_108] : memref<12xf32, #tpu.memory_space<smem>>
    %385 = vector.broadcast %384 : f32 to vector<8x128xf32>
    %386 = arith.mulf %383, %385 : vector<8x128xf32>
    %387 = arith.addf %1, %386 : vector<8x128xf32>
    %c4_109 = arith.constant 4 : index
    %388 = memref.load %arg2[%c4_109] : memref<12xf32, #tpu.memory_space<smem>>
    %389 = vector.broadcast %388 : f32 to vector<8x128xf32>
    %390 = arith.mulf %383, %389 : vector<8x128xf32>
    %391 = arith.addf %3, %390 : vector<8x128xf32>
    %c8_110 = arith.constant 8 : index
    %392 = memref.load %arg2[%c8_110] : memref<12xf32, #tpu.memory_space<smem>>
    %393 = vector.broadcast %392 : f32 to vector<8x128xf32>
    %394 = arith.mulf %383, %393 : vector<8x128xf32>
    %395 = arith.addf %5, %394 : vector<8x128xf32>
    %c17 = arith.constant 17 : index
    %396 = arith.index_cast %10 : i32 to index
    %c0_111 = arith.constant 0 : index
    %c0_112 = arith.constant 0 : index
    %397 = vector.load %arg1[%c17, %396, %c0_111, %c0_112] : memref<32x1x8x128xbf16, #tpu.memory_space<vmem>>, vector<1x1x8x128xbf16>
    %398 = vector.shape_cast %397 : vector<1x1x8x128xbf16> to vector<8x128xbf16>
    %399 = arith.extf %398 : vector<8x128xbf16> to vector<8x128xf32>
    %c1_113 = arith.constant 1 : index
    %400 = memref.load %arg2[%c1_113] : memref<12xf32, #tpu.memory_space<smem>>
    %401 = vector.broadcast %400 : f32 to vector<8x128xf32>
    %402 = arith.mulf %399, %401 : vector<8x128xf32>
    %403 = arith.addf %387, %402 : vector<8x128xf32>
    %c5_114 = arith.constant 5 : index
    %404 = memref.load %arg2[%c5_114] : memref<12xf32, #tpu.memory_space<smem>>
    %405 = vector.broadcast %404 : f32 to vector<8x128xf32>
    %406 = arith.mulf %399, %405 : vector<8x128xf32>
    %407 = arith.addf %391, %406 : vector<8x128xf32>
    %c9_115 = arith.constant 9 : index
    %408 = memref.load %arg2[%c9_115] : memref<12xf32, #tpu.memory_space<smem>>
    %409 = vector.broadcast %408 : f32 to vector<8x128xf32>
    %410 = arith.mulf %399, %409 : vector<8x128xf32>
    %411 = arith.addf %395, %410 : vector<8x128xf32>
    %c18 = arith.constant 18 : index
    %412 = arith.index_cast %10 : i32 to index
    %c0_116 = arith.constant 0 : index
    %c0_117 = arith.constant 0 : index
    %413 = vector.load %arg1[%c18, %412, %c0_116, %c0_117] : memref<32x1x8x128xbf16, #tpu.memory_space<vmem>>, vector<1x1x8x128xbf16>
    %414 = vector.shape_cast %413 : vector<1x1x8x128xbf16> to vector<8x128xbf16>
    %415 = arith.extf %414 : vector<8x128xbf16> to vector<8x128xf32>
    %c2_118 = arith.constant 2 : index
    %416 = memref.load %arg2[%c2_118] : memref<12xf32, #tpu.memory_space<smem>>
    %417 = vector.broadcast %416 : f32 to vector<8x128xf32>
    %418 = arith.mulf %415, %417 : vector<8x128xf32>
    %419 = arith.addf %403, %418 : vector<8x128xf32>
    %c6_119 = arith.constant 6 : index
    %420 = memref.load %arg2[%c6_119] : memref<12xf32, #tpu.memory_space<smem>>
    %421 = vector.broadcast %420 : f32 to vector<8x128xf32>
    %422 = arith.mulf %415, %421 : vector<8x128xf32>
    %423 = arith.addf %407, %422 : vector<8x128xf32>
    %c10_120 = arith.constant 10 : index
    %424 = memref.load %arg2[%c10_120] : memref<12xf32, #tpu.memory_space<smem>>
    %425 = vector.broadcast %424 : f32 to vector<8x128xf32>
    %426 = arith.mulf %415, %425 : vector<8x128xf32>
    %427 = arith.addf %411, %426 : vector<8x128xf32>
    %c19 = arith.constant 19 : index
    %428 = arith.index_cast %10 : i32 to index
    %c0_121 = arith.constant 0 : index
    %c0_122 = arith.constant 0 : index
    %429 = vector.load %arg1[%c19, %428, %c0_121, %c0_122] : memref<32x1x8x128xbf16, #tpu.memory_space<vmem>>, vector<1x1x8x128xbf16>
    %430 = vector.shape_cast %429 : vector<1x1x8x128xbf16> to vector<8x128xbf16>
    %431 = arith.extf %430 : vector<8x128xbf16> to vector<8x128xf32>
    %c3_123 = arith.constant 3 : index
    %432 = memref.load %arg2[%c3_123] : memref<12xf32, #tpu.memory_space<smem>>
    %433 = vector.broadcast %432 : f32 to vector<8x128xf32>
    %434 = arith.mulf %431, %433 : vector<8x128xf32>
    %435 = arith.addf %419, %434 : vector<8x128xf32>
    %c7_124 = arith.constant 7 : index
    %436 = memref.load %arg2[%c7_124] : memref<12xf32, #tpu.memory_space<smem>>
    %437 = vector.broadcast %436 : f32 to vector<8x128xf32>
    %438 = arith.mulf %431, %437 : vector<8x128xf32>
    %439 = arith.addf %423, %438 : vector<8x128xf32>
    %c11_125 = arith.constant 11 : index
    %440 = memref.load %arg2[%c11_125] : memref<12xf32, #tpu.memory_space<smem>>
    %441 = vector.broadcast %440 : f32 to vector<8x128xf32>
    %442 = arith.mulf %431, %441 : vector<8x128xf32>
    %443 = arith.addf %427, %442 : vector<8x128xf32>
    %c0_126 = arith.constant 0 : index
    %444 = memref.load %arg3[%c0_126] : memref<3xf32, #tpu.memory_space<smem>>
    %445 = vector.broadcast %444 : f32 to vector<8x128xf32>
    %446 = arith.mulf %379, %445 : vector<8x128xf32>
    %447 = arith.addf %435, %446 : vector<8x128xf32>
    %448 = arith.negf %447 : vector<8x128xf32>
    %449 = math.exp %448 : vector<8x128xf32>
    %cst_127 = arith.constant 1.000000e+00 : f32
    %450 = vector.broadcast %cst_127 : f32 to vector<8x128xf32>
    %451 = arith.addf %450, %449 : vector<8x128xf32>
    %452 = arith.divf %450, %451 : vector<8x128xf32>
    %c1_128 = arith.constant 1 : index
    %453 = memref.load %arg3[%c1_128] : memref<3xf32, #tpu.memory_space<smem>>
    %454 = vector.broadcast %453 : f32 to vector<8x128xf32>
    %455 = arith.mulf %379, %454 : vector<8x128xf32>
    %456 = arith.addf %439, %455 : vector<8x128xf32>
    %457 = arith.negf %456 : vector<8x128xf32>
    %458 = math.exp %457 : vector<8x128xf32>
    %cst_129 = arith.constant 1.000000e+00 : f32
    %459 = vector.broadcast %cst_129 : f32 to vector<8x128xf32>
    %460 = arith.addf %459, %458 : vector<8x128xf32>
    %461 = arith.divf %459, %460 : vector<8x128xf32>
    %c2_130 = arith.constant 2 : index
    %462 = memref.load %arg3[%c2_130] : memref<3xf32, #tpu.memory_space<smem>>
    %463 = vector.broadcast %462 : f32 to vector<8x128xf32>
    %464 = arith.mulf %379, %463 : vector<8x128xf32>
    %465 = arith.addf %464, %7 : vector<8x128xf32>
    %466 = arith.mulf %452, %465 : vector<8x128xf32>
    %467 = arith.addf %443, %466 : vector<8x128xf32>
    %468 = math.tanh %467 : vector<8x128xf32>
    %469 = arith.subf %379, %468 : vector<8x128xf32>
    %470 = arith.mulf %461, %469 : vector<8x128xf32>
    %471 = arith.addf %468, %470 : vector<8x128xf32>
    %c20 = arith.constant 20 : index
    %472 = arith.index_cast %10 : i32 to index
    %c0_131 = arith.constant 0 : index
    %c0_132 = arith.constant 0 : index
    %473 = vector.load %arg1[%c20, %472, %c0_131, %c0_132] : memref<32x1x8x128xbf16, #tpu.memory_space<vmem>>, vector<1x1x8x128xbf16>
    %474 = vector.shape_cast %473 : vector<1x1x8x128xbf16> to vector<8x128xbf16>
    %475 = arith.extf %474 : vector<8x128xbf16> to vector<8x128xf32>
    %c0_133 = arith.constant 0 : index
    %476 = memref.load %arg2[%c0_133] : memref<12xf32, #tpu.memory_space<smem>>
    %477 = vector.broadcast %476 : f32 to vector<8x128xf32>
    %478 = arith.mulf %475, %477 : vector<8x128xf32>
    %479 = arith.addf %1, %478 : vector<8x128xf32>
    %c4_134 = arith.constant 4 : index
    %480 = memref.load %arg2[%c4_134] : memref<12xf32, #tpu.memory_space<smem>>
    %481 = vector.broadcast %480 : f32 to vector<8x128xf32>
    %482 = arith.mulf %475, %481 : vector<8x128xf32>
    %483 = arith.addf %3, %482 : vector<8x128xf32>
    %c8_135 = arith.constant 8 : index
    %484 = memref.load %arg2[%c8_135] : memref<12xf32, #tpu.memory_space<smem>>
    %485 = vector.broadcast %484 : f32 to vector<8x128xf32>
    %486 = arith.mulf %475, %485 : vector<8x128xf32>
    %487 = arith.addf %5, %486 : vector<8x128xf32>
    %c21 = arith.constant 21 : index
    %488 = arith.index_cast %10 : i32 to index
    %c0_136 = arith.constant 0 : index
    %c0_137 = arith.constant 0 : index
    %489 = vector.load %arg1[%c21, %488, %c0_136, %c0_137] : memref<32x1x8x128xbf16, #tpu.memory_space<vmem>>, vector<1x1x8x128xbf16>
    %490 = vector.shape_cast %489 : vector<1x1x8x128xbf16> to vector<8x128xbf16>
    %491 = arith.extf %490 : vector<8x128xbf16> to vector<8x128xf32>
    %c1_138 = arith.constant 1 : index
    %492 = memref.load %arg2[%c1_138] : memref<12xf32, #tpu.memory_space<smem>>
    %493 = vector.broadcast %492 : f32 to vector<8x128xf32>
    %494 = arith.mulf %491, %493 : vector<8x128xf32>
    %495 = arith.addf %479, %494 : vector<8x128xf32>
    %c5_139 = arith.constant 5 : index
    %496 = memref.load %arg2[%c5_139] : memref<12xf32, #tpu.memory_space<smem>>
    %497 = vector.broadcast %496 : f32 to vector<8x128xf32>
    %498 = arith.mulf %491, %497 : vector<8x128xf32>
    %499 = arith.addf %483, %498 : vector<8x128xf32>
    %c9_140 = arith.constant 9 : index
    %500 = memref.load %arg2[%c9_140] : memref<12xf32, #tpu.memory_space<smem>>
    %501 = vector.broadcast %500 : f32 to vector<8x128xf32>
    %502 = arith.mulf %491, %501 : vector<8x128xf32>
    %503 = arith.addf %487, %502 : vector<8x128xf32>
    %c22 = arith.constant 22 : index
    %504 = arith.index_cast %10 : i32 to index
    %c0_141 = arith.constant 0 : index
    %c0_142 = arith.constant 0 : index
    %505 = vector.load %arg1[%c22, %504, %c0_141, %c0_142] : memref<32x1x8x128xbf16, #tpu.memory_space<vmem>>, vector<1x1x8x128xbf16>
    %506 = vector.shape_cast %505 : vector<1x1x8x128xbf16> to vector<8x128xbf16>
    %507 = arith.extf %506 : vector<8x128xbf16> to vector<8x128xf32>
    %c2_143 = arith.constant 2 : index
    %508 = memref.load %arg2[%c2_143] : memref<12xf32, #tpu.memory_space<smem>>
    %509 = vector.broadcast %508 : f32 to vector<8x128xf32>
    %510 = arith.mulf %507, %509 : vector<8x128xf32>
    %511 = arith.addf %495, %510 : vector<8x128xf32>
    %c6_144 = arith.constant 6 : index
    %512 = memref.load %arg2[%c6_144] : memref<12xf32, #tpu.memory_space<smem>>
    %513 = vector.broadcast %512 : f32 to vector<8x128xf32>
    %514 = arith.mulf %507, %513 : vector<8x128xf32>
    %515 = arith.addf %499, %514 : vector<8x128xf32>
    %c10_145 = arith.constant 10 : index
    %516 = memref.load %arg2[%c10_145] : memref<12xf32, #tpu.memory_space<smem>>
    %517 = vector.broadcast %516 : f32 to vector<8x128xf32>
    %518 = arith.mulf %507, %517 : vector<8x128xf32>
    %519 = arith.addf %503, %518 : vector<8x128xf32>
    %c23 = arith.constant 23 : index
    %520 = arith.index_cast %10 : i32 to index
    %c0_146 = arith.constant 0 : index
    %c0_147 = arith.constant 0 : index
    %521 = vector.load %arg1[%c23, %520, %c0_146, %c0_147] : memref<32x1x8x128xbf16, #tpu.memory_space<vmem>>, vector<1x1x8x128xbf16>
    %522 = vector.shape_cast %521 : vector<1x1x8x128xbf16> to vector<8x128xbf16>
    %523 = arith.extf %522 : vector<8x128xbf16> to vector<8x128xf32>
    %c3_148 = arith.constant 3 : index
    %524 = memref.load %arg2[%c3_148] : memref<12xf32, #tpu.memory_space<smem>>
    %525 = vector.broadcast %524 : f32 to vector<8x128xf32>
    %526 = arith.mulf %523, %525 : vector<8x128xf32>
    %527 = arith.addf %511, %526 : vector<8x128xf32>
    %c7_149 = arith.constant 7 : index
    %528 = memref.load %arg2[%c7_149] : memref<12xf32, #tpu.memory_space<smem>>
    %529 = vector.broadcast %528 : f32 to vector<8x128xf32>
    %530 = arith.mulf %523, %529 : vector<8x128xf32>
    %531 = arith.addf %515, %530 : vector<8x128xf32>
    %c11_150 = arith.constant 11 : index
    %532 = memref.load %arg2[%c11_150] : memref<12xf32, #tpu.memory_space<smem>>
    %533 = vector.broadcast %532 : f32 to vector<8x128xf32>
    %534 = arith.mulf %523, %533 : vector<8x128xf32>
    %535 = arith.addf %519, %534 : vector<8x128xf32>
    %c0_151 = arith.constant 0 : index
    %536 = memref.load %arg3[%c0_151] : memref<3xf32, #tpu.memory_space<smem>>
    %537 = vector.broadcast %536 : f32 to vector<8x128xf32>
    %538 = arith.mulf %471, %537 : vector<8x128xf32>
    %539 = arith.addf %527, %538 : vector<8x128xf32>
    %540 = arith.negf %539 : vector<8x128xf32>
    %541 = math.exp %540 : vector<8x128xf32>
    %cst_152 = arith.constant 1.000000e+00 : f32
    %542 = vector.broadcast %cst_152 : f32 to vector<8x128xf32>
    %543 = arith.addf %542, %541 : vector<8x128xf32>
    %544 = arith.divf %542, %543 : vector<8x128xf32>
    %c1_153 = arith.constant 1 : index
    %545 = memref.load %arg3[%c1_153] : memref<3xf32, #tpu.memory_space<smem>>
    %546 = vector.broadcast %545 : f32 to vector<8x128xf32>
    %547 = arith.mulf %471, %546 : vector<8x128xf32>
    %548 = arith.addf %531, %547 : vector<8x128xf32>
    %549 = arith.negf %548 : vector<8x128xf32>
    %550 = math.exp %549 : vector<8x128xf32>
    %cst_154 = arith.constant 1.000000e+00 : f32
    %551 = vector.broadcast %cst_154 : f32 to vector<8x128xf32>
    %552 = arith.addf %551, %550 : vector<8x128xf32>
    %553 = arith.divf %551, %552 : vector<8x128xf32>
    %c2_155 = arith.constant 2 : index
    %554 = memref.load %arg3[%c2_155] : memref<3xf32, #tpu.memory_space<smem>>
    %555 = vector.broadcast %554 : f32 to vector<8x128xf32>
    %556 = arith.mulf %471, %555 : vector<8x128xf32>
    %557 = arith.addf %556, %7 : vector<8x128xf32>
    %558 = arith.mulf %544, %557 : vector<8x128xf32>
    %559 = arith.addf %535, %558 : vector<8x128xf32>
    %560 = math.tanh %559 : vector<8x128xf32>
    %561 = arith.subf %471, %560 : vector<8x128xf32>
    %562 = arith.mulf %553, %561 : vector<8x128xf32>
    %563 = arith.addf %560, %562 : vector<8x128xf32>
    %c24 = arith.constant 24 : index
    %564 = arith.index_cast %10 : i32 to index
    %c0_156 = arith.constant 0 : index
    %c0_157 = arith.constant 0 : index
    %565 = vector.load %arg1[%c24, %564, %c0_156, %c0_157] : memref<32x1x8x128xbf16, #tpu.memory_space<vmem>>, vector<1x1x8x128xbf16>
    %566 = vector.shape_cast %565 : vector<1x1x8x128xbf16> to vector<8x128xbf16>
    %567 = arith.extf %566 : vector<8x128xbf16> to vector<8x128xf32>
    %c0_158 = arith.constant 0 : index
    %568 = memref.load %arg2[%c0_158] : memref<12xf32, #tpu.memory_space<smem>>
    %569 = vector.broadcast %568 : f32 to vector<8x128xf32>
    %570 = arith.mulf %567, %569 : vector<8x128xf32>
    %571 = arith.addf %1, %570 : vector<8x128xf32>
    %c4_159 = arith.constant 4 : index
    %572 = memref.load %arg2[%c4_159] : memref<12xf32, #tpu.memory_space<smem>>
    %573 = vector.broadcast %572 : f32 to vector<8x128xf32>
    %574 = arith.mulf %567, %573 : vector<8x128xf32>
    %575 = arith.addf %3, %574 : vector<8x128xf32>
    %c8_160 = arith.constant 8 : index
    %576 = memref.load %arg2[%c8_160] : memref<12xf32, #tpu.memory_space<smem>>
    %577 = vector.broadcast %576 : f32 to vector<8x128xf32>
    %578 = arith.mulf %567, %577 : vector<8x128xf32>
    %579 = arith.addf %5, %578 : vector<8x128xf32>
    %c25 = arith.constant 25 : index
    %580 = arith.index_cast %10 : i32 to index
    %c0_161 = arith.constant 0 : index
    %c0_162 = arith.constant 0 : index
    %581 = vector.load %arg1[%c25, %580, %c0_161, %c0_162] : memref<32x1x8x128xbf16, #tpu.memory_space<vmem>>, vector<1x1x8x128xbf16>
    %582 = vector.shape_cast %581 : vector<1x1x8x128xbf16> to vector<8x128xbf16>
    %583 = arith.extf %582 : vector<8x128xbf16> to vector<8x128xf32>
    %c1_163 = arith.constant 1 : index
    %584 = memref.load %arg2[%c1_163] : memref<12xf32, #tpu.memory_space<smem>>
    %585 = vector.broadcast %584 : f32 to vector<8x128xf32>
    %586 = arith.mulf %583, %585 : vector<8x128xf32>
    %587 = arith.addf %571, %586 : vector<8x128xf32>
    %c5_164 = arith.constant 5 : index
    %588 = memref.load %arg2[%c5_164] : memref<12xf32, #tpu.memory_space<smem>>
    %589 = vector.broadcast %588 : f32 to vector<8x128xf32>
    %590 = arith.mulf %583, %589 : vector<8x128xf32>
    %591 = arith.addf %575, %590 : vector<8x128xf32>
    %c9_165 = arith.constant 9 : index
    %592 = memref.load %arg2[%c9_165] : memref<12xf32, #tpu.memory_space<smem>>
    %593 = vector.broadcast %592 : f32 to vector<8x128xf32>
    %594 = arith.mulf %583, %593 : vector<8x128xf32>
    %595 = arith.addf %579, %594 : vector<8x128xf32>
    %c26 = arith.constant 26 : index
    %596 = arith.index_cast %10 : i32 to index
    %c0_166 = arith.constant 0 : index
    %c0_167 = arith.constant 0 : index
    %597 = vector.load %arg1[%c26, %596, %c0_166, %c0_167] : memref<32x1x8x128xbf16, #tpu.memory_space<vmem>>, vector<1x1x8x128xbf16>
    %598 = vector.shape_cast %597 : vector<1x1x8x128xbf16> to vector<8x128xbf16>
    %599 = arith.extf %598 : vector<8x128xbf16> to vector<8x128xf32>
    %c2_168 = arith.constant 2 : index
    %600 = memref.load %arg2[%c2_168] : memref<12xf32, #tpu.memory_space<smem>>
    %601 = vector.broadcast %600 : f32 to vector<8x128xf32>
    %602 = arith.mulf %599, %601 : vector<8x128xf32>
    %603 = arith.addf %587, %602 : vector<8x128xf32>
    %c6_169 = arith.constant 6 : index
    %604 = memref.load %arg2[%c6_169] : memref<12xf32, #tpu.memory_space<smem>>
    %605 = vector.broadcast %604 : f32 to vector<8x128xf32>
    %606 = arith.mulf %599, %605 : vector<8x128xf32>
    %607 = arith.addf %591, %606 : vector<8x128xf32>
    %c10_170 = arith.constant 10 : index
    %608 = memref.load %arg2[%c10_170] : memref<12xf32, #tpu.memory_space<smem>>
    %609 = vector.broadcast %608 : f32 to vector<8x128xf32>
    %610 = arith.mulf %599, %609 : vector<8x128xf32>
    %611 = arith.addf %595, %610 : vector<8x128xf32>
    %c27 = arith.constant 27 : index
    %612 = arith.index_cast %10 : i32 to index
    %c0_171 = arith.constant 0 : index
    %c0_172 = arith.constant 0 : index
    %613 = vector.load %arg1[%c27, %612, %c0_171, %c0_172] : memref<32x1x8x128xbf16, #tpu.memory_space<vmem>>, vector<1x1x8x128xbf16>
    %614 = vector.shape_cast %613 : vector<1x1x8x128xbf16> to vector<8x128xbf16>
    %615 = arith.extf %614 : vector<8x128xbf16> to vector<8x128xf32>
    %c3_173 = arith.constant 3 : index
    %616 = memref.load %arg2[%c3_173] : memref<12xf32, #tpu.memory_space<smem>>
    %617 = vector.broadcast %616 : f32 to vector<8x128xf32>
    %618 = arith.mulf %615, %617 : vector<8x128xf32>
    %619 = arith.addf %603, %618 : vector<8x128xf32>
    %c7_174 = arith.constant 7 : index
    %620 = memref.load %arg2[%c7_174] : memref<12xf32, #tpu.memory_space<smem>>
    %621 = vector.broadcast %620 : f32 to vector<8x128xf32>
    %622 = arith.mulf %615, %621 : vector<8x128xf32>
    %623 = arith.addf %607, %622 : vector<8x128xf32>
    %c11_175 = arith.constant 11 : index
    %624 = memref.load %arg2[%c11_175] : memref<12xf32, #tpu.memory_space<smem>>
    %625 = vector.broadcast %624 : f32 to vector<8x128xf32>
    %626 = arith.mulf %615, %625 : vector<8x128xf32>
    %627 = arith.addf %611, %626 : vector<8x128xf32>
    %c0_176 = arith.constant 0 : index
    %628 = memref.load %arg3[%c0_176] : memref<3xf32, #tpu.memory_space<smem>>
    %629 = vector.broadcast %628 : f32 to vector<8x128xf32>
    %630 = arith.mulf %563, %629 : vector<8x128xf32>
    %631 = arith.addf %619, %630 : vector<8x128xf32>
    %632 = arith.negf %631 : vector<8x128xf32>
    %633 = math.exp %632 : vector<8x128xf32>
    %cst_177 = arith.constant 1.000000e+00 : f32
    %634 = vector.broadcast %cst_177 : f32 to vector<8x128xf32>
    %635 = arith.addf %634, %633 : vector<8x128xf32>
    %636 = arith.divf %634, %635 : vector<8x128xf32>
    %c1_178 = arith.constant 1 : index
    %637 = memref.load %arg3[%c1_178] : memref<3xf32, #tpu.memory_space<smem>>
    %638 = vector.broadcast %637 : f32 to vector<8x128xf32>
    %639 = arith.mulf %563, %638 : vector<8x128xf32>
    %640 = arith.addf %623, %639 : vector<8x128xf32>
    %641 = arith.negf %640 : vector<8x128xf32>
    %642 = math.exp %641 : vector<8x128xf32>
    %cst_179 = arith.constant 1.000000e+00 : f32
    %643 = vector.broadcast %cst_179 : f32 to vector<8x128xf32>
    %644 = arith.addf %643, %642 : vector<8x128xf32>
    %645 = arith.divf %643, %644 : vector<8x128xf32>
    %c2_180 = arith.constant 2 : index
    %646 = memref.load %arg3[%c2_180] : memref<3xf32, #tpu.memory_space<smem>>
    %647 = vector.broadcast %646 : f32 to vector<8x128xf32>
    %648 = arith.mulf %563, %647 : vector<8x128xf32>
    %649 = arith.addf %648, %7 : vector<8x128xf32>
    %650 = arith.mulf %636, %649 : vector<8x128xf32>
    %651 = arith.addf %627, %650 : vector<8x128xf32>
    %652 = math.tanh %651 : vector<8x128xf32>
    %653 = arith.subf %563, %652 : vector<8x128xf32>
    %654 = arith.mulf %645, %653 : vector<8x128xf32>
    %655 = arith.addf %652, %654 : vector<8x128xf32>
    %c28 = arith.constant 28 : index
    %656 = arith.index_cast %10 : i32 to index
    %c0_181 = arith.constant 0 : index
    %c0_182 = arith.constant 0 : index
    %657 = vector.load %arg1[%c28, %656, %c0_181, %c0_182] : memref<32x1x8x128xbf16, #tpu.memory_space<vmem>>, vector<1x1x8x128xbf16>
    %658 = vector.shape_cast %657 : vector<1x1x8x128xbf16> to vector<8x128xbf16>
    %659 = arith.extf %658 : vector<8x128xbf16> to vector<8x128xf32>
    %c0_183 = arith.constant 0 : index
    %660 = memref.load %arg2[%c0_183] : memref<12xf32, #tpu.memory_space<smem>>
    %661 = vector.broadcast %660 : f32 to vector<8x128xf32>
    %662 = arith.mulf %659, %661 : vector<8x128xf32>
    %663 = arith.addf %1, %662 : vector<8x128xf32>
    %c4_184 = arith.constant 4 : index
    %664 = memref.load %arg2[%c4_184] : memref<12xf32, #tpu.memory_space<smem>>
    %665 = vector.broadcast %664 : f32 to vector<8x128xf32>
    %666 = arith.mulf %659, %665 : vector<8x128xf32>
    %667 = arith.addf %3, %666 : vector<8x128xf32>
    %c8_185 = arith.constant 8 : index
    %668 = memref.load %arg2[%c8_185] : memref<12xf32, #tpu.memory_space<smem>>
    %669 = vector.broadcast %668 : f32 to vector<8x128xf32>
    %670 = arith.mulf %659, %669 : vector<8x128xf32>
    %671 = arith.addf %5, %670 : vector<8x128xf32>
    %c29 = arith.constant 29 : index
    %672 = arith.index_cast %10 : i32 to index
    %c0_186 = arith.constant 0 : index
    %c0_187 = arith.constant 0 : index
    %673 = vector.load %arg1[%c29, %672, %c0_186, %c0_187] : memref<32x1x8x128xbf16, #tpu.memory_space<vmem>>, vector<1x1x8x128xbf16>
    %674 = vector.shape_cast %673 : vector<1x1x8x128xbf16> to vector<8x128xbf16>
    %675 = arith.extf %674 : vector<8x128xbf16> to vector<8x128xf32>
    %c1_188 = arith.constant 1 : index
    %676 = memref.load %arg2[%c1_188] : memref<12xf32, #tpu.memory_space<smem>>
    %677 = vector.broadcast %676 : f32 to vector<8x128xf32>
    %678 = arith.mulf %675, %677 : vector<8x128xf32>
    %679 = arith.addf %663, %678 : vector<8x128xf32>
    %c5_189 = arith.constant 5 : index
    %680 = memref.load %arg2[%c5_189] : memref<12xf32, #tpu.memory_space<smem>>
    %681 = vector.broadcast %680 : f32 to vector<8x128xf32>
    %682 = arith.mulf %675, %681 : vector<8x128xf32>
    %683 = arith.addf %667, %682 : vector<8x128xf32>
    %c9_190 = arith.constant 9 : index
    %684 = memref.load %arg2[%c9_190] : memref<12xf32, #tpu.memory_space<smem>>
    %685 = vector.broadcast %684 : f32 to vector<8x128xf32>
    %686 = arith.mulf %675, %685 : vector<8x128xf32>
    %687 = arith.addf %671, %686 : vector<8x128xf32>
    %c30 = arith.constant 30 : index
    %688 = arith.index_cast %10 : i32 to index
    %c0_191 = arith.constant 0 : index
    %c0_192 = arith.constant 0 : index
    %689 = vector.load %arg1[%c30, %688, %c0_191, %c0_192] : memref<32x1x8x128xbf16, #tpu.memory_space<vmem>>, vector<1x1x8x128xbf16>
    %690 = vector.shape_cast %689 : vector<1x1x8x128xbf16> to vector<8x128xbf16>
    %691 = arith.extf %690 : vector<8x128xbf16> to vector<8x128xf32>
    %c2_193 = arith.constant 2 : index
    %692 = memref.load %arg2[%c2_193] : memref<12xf32, #tpu.memory_space<smem>>
    %693 = vector.broadcast %692 : f32 to vector<8x128xf32>
    %694 = arith.mulf %691, %693 : vector<8x128xf32>
    %695 = arith.addf %679, %694 : vector<8x128xf32>
    %c6_194 = arith.constant 6 : index
    %696 = memref.load %arg2[%c6_194] : memref<12xf32, #tpu.memory_space<smem>>
    %697 = vector.broadcast %696 : f32 to vector<8x128xf32>
    %698 = arith.mulf %691, %697 : vector<8x128xf32>
    %699 = arith.addf %683, %698 : vector<8x128xf32>
    %c10_195 = arith.constant 10 : index
    %700 = memref.load %arg2[%c10_195] : memref<12xf32, #tpu.memory_space<smem>>
    %701 = vector.broadcast %700 : f32 to vector<8x128xf32>
    %702 = arith.mulf %691, %701 : vector<8x128xf32>
    %703 = arith.addf %687, %702 : vector<8x128xf32>
    %c31 = arith.constant 31 : index
    %704 = arith.index_cast %10 : i32 to index
    %c0_196 = arith.constant 0 : index
    %c0_197 = arith.constant 0 : index
    %705 = vector.load %arg1[%c31, %704, %c0_196, %c0_197] : memref<32x1x8x128xbf16, #tpu.memory_space<vmem>>, vector<1x1x8x128xbf16>
    %706 = vector.shape_cast %705 : vector<1x1x8x128xbf16> to vector<8x128xbf16>
    %707 = arith.extf %706 : vector<8x128xbf16> to vector<8x128xf32>
    %c3_198 = arith.constant 3 : index
    %708 = memref.load %arg2[%c3_198] : memref<12xf32, #tpu.memory_space<smem>>
    %709 = vector.broadcast %708 : f32 to vector<8x128xf32>
    %710 = arith.mulf %707, %709 : vector<8x128xf32>
    %711 = arith.addf %695, %710 : vector<8x128xf32>
    %c7_199 = arith.constant 7 : index
    %712 = memref.load %arg2[%c7_199] : memref<12xf32, #tpu.memory_space<smem>>
    %713 = vector.broadcast %712 : f32 to vector<8x128xf32>
    %714 = arith.mulf %707, %713 : vector<8x128xf32>
    %715 = arith.addf %699, %714 : vector<8x128xf32>
    %c11_200 = arith.constant 11 : index
    %716 = memref.load %arg2[%c11_200] : memref<12xf32, #tpu.memory_space<smem>>
    %717 = vector.broadcast %716 : f32 to vector<8x128xf32>
    %718 = arith.mulf %707, %717 : vector<8x128xf32>
    %719 = arith.addf %703, %718 : vector<8x128xf32>
    %c0_201 = arith.constant 0 : index
    %720 = memref.load %arg3[%c0_201] : memref<3xf32, #tpu.memory_space<smem>>
    %721 = vector.broadcast %720 : f32 to vector<8x128xf32>
    %722 = arith.mulf %655, %721 : vector<8x128xf32>
    %723 = arith.addf %711, %722 : vector<8x128xf32>
    %724 = arith.negf %723 : vector<8x128xf32>
    %725 = math.exp %724 : vector<8x128xf32>
    %cst_202 = arith.constant 1.000000e+00 : f32
    %726 = vector.broadcast %cst_202 : f32 to vector<8x128xf32>
    %727 = arith.addf %726, %725 : vector<8x128xf32>
    %728 = arith.divf %726, %727 : vector<8x128xf32>
    %c1_203 = arith.constant 1 : index
    %729 = memref.load %arg3[%c1_203] : memref<3xf32, #tpu.memory_space<smem>>
    %730 = vector.broadcast %729 : f32 to vector<8x128xf32>
    %731 = arith.mulf %655, %730 : vector<8x128xf32>
    %732 = arith.addf %715, %731 : vector<8x128xf32>
    %733 = arith.negf %732 : vector<8x128xf32>
    %734 = math.exp %733 : vector<8x128xf32>
    %cst_204 = arith.constant 1.000000e+00 : f32
    %735 = vector.broadcast %cst_204 : f32 to vector<8x128xf32>
    %736 = arith.addf %735, %734 : vector<8x128xf32>
    %737 = arith.divf %735, %736 : vector<8x128xf32>
    %c2_205 = arith.constant 2 : index
    %738 = memref.load %arg3[%c2_205] : memref<3xf32, #tpu.memory_space<smem>>
    %739 = vector.broadcast %738 : f32 to vector<8x128xf32>
    %740 = arith.mulf %655, %739 : vector<8x128xf32>
    %741 = arith.addf %740, %7 : vector<8x128xf32>
    %742 = arith.mulf %728, %741 : vector<8x128xf32>
    %743 = arith.addf %719, %742 : vector<8x128xf32>
    %744 = math.tanh %743 : vector<8x128xf32>
    %745 = arith.subf %655, %744 : vector<8x128xf32>
    %746 = arith.mulf %737, %745 : vector<8x128xf32>
    %747 = arith.addf %744, %746 : vector<8x128xf32>
    %748 = tpu.concatenate %103, %195, %287, %379, %471, %563, %655, %747, %8 in 0 : vector<8x128xf32>, vector<8x128xf32>, vector<8x128xf32>, vector<8x128xf32>, vector<8x128xf32>, vector<8x128xf32>, vector<8x128xf32>, vector<8x128xf32>, vector<8x128xf32> -> vector<72x128xf32>
    %c0_206 = arith.constant 0 : index
    %c0_207 = arith.constant 0 : index
    %749 = vector.load %arg5[%c0_206, %c0_207] : memref<256x72xf32, #tpu.memory_space<vmem>>, vector<128x72xf32>
    %cst_208 = arith.constant dense<0.000000e+00> : vector<128x128xf32>
    %750 = tpu.matmul %749, %748, %cst_208 {dimension_numbers = #tpu.dot_dimension_numbers<[1], [0], [0], [1], [0, 0, 1, 1], [], []>} : vector<128x72xf32>, vector<72x128xf32>, vector<128x128xf32> -> vector<128x128xf32>
    %751 = vector.shape_cast %750 : vector<128x128xf32> to vector<16x8x128xf32>
    %c0_209 = arith.constant 0 : index
    %752 = arith.index_cast %10 : i32 to index
    %c0_210 = arith.constant 0 : index
    %c0_211 = arith.constant 0 : index
    %753 = vector.load %arg6[%c0_209, %752, %c0_210, %c0_211] : memref<32x1x8x128xf32, #tpu.memory_space<vmem>>, vector<16x1x8x128xf32>
    %754 = vector.shape_cast %753 : vector<16x1x8x128xf32> to vector<16x8x128xf32>
    %755 = vector.shape_cast %751 : vector<16x8x128xf32> to vector<16x1x8x128xf32>
    tpu.vector_store %arg6[%c0_209, %752, %c0_210, %c0_211], %755 {strides = array<i32>} : memref<32x1x8x128xf32, #tpu.memory_space<vmem>>, vector<16x1x8x128xf32>,
    %c128 = arith.constant 128 : index
    %c0_212 = arith.constant 0 : index
    %756 = vector.load %arg5[%c128, %c0_212] : memref<256x72xf32, #tpu.memory_space<vmem>>, vector<128x72xf32>
    %cst_213 = arith.constant dense<0.000000e+00> : vector<128x128xf32>
    %757 = tpu.matmul %756, %748, %cst_213 {dimension_numbers = #tpu.dot_dimension_numbers<[1], [0], [0], [1], [0, 0, 1, 1], [], []>} : vector<128x72xf32>, vector<72x128xf32>, vector<128x128xf32> -> vector<128x128xf32>
    %758 = vector.shape_cast %757 : vector<128x128xf32> to vector<16x8x128xf32>
    %c16_214 = arith.constant 16 : index
    %759 = arith.index_cast %10 : i32 to index
    %c0_215 = arith.constant 0 : index
    %c0_216 = arith.constant 0 : index
    %760 = vector.load %arg6[%c16_214, %759, %c0_215, %c0_216] : memref<32x1x8x128xf32, #tpu.memory_space<vmem>>, vector<16x1x8x128xf32>
    %761 = vector.shape_cast %760 : vector<16x1x8x128xf32> to vector<16x8x128xf32>
    %762 = vector.shape_cast %758 : vector<16x8x128xf32> to vector<16x1x8x128xf32>
    tpu.vector_store %arg6[%c16_214, %759, %c0_215, %c0_216], %762 {strides = array<i32>} : memref<32x1x8x128xf32, #tpu.memory_space<vmem>>, vector<16x1x8x128xf32>,
    %c1_i32_217 = arith.constant 1 : i32
    return
  }
  func.func @transform_0(%arg0: i32) -> (i32, i32, i32, i32) {
    %c0_i32 = arith.constant 0 : i32
    %c0_i32_0 = arith.constant 0 : i32
    %c0_i32_1 = arith.constant 0 : i32
    %c0_i32_2 = arith.constant 0 : i32
    return %c0_i32, %arg0, %c0_i32_0, %c0_i32_1 : i32, i32, i32, i32
  }
  func.func @transform_1(%arg0: i32) -> i32 {
    %c0_i32 = arith.constant 0 : i32
    %c0_i32_0 = arith.constant 0 : i32
    return %c0_i32 : i32
  }
  func.func @transform_2(%arg0: i32) -> i32 {
    %c0_i32 = arith.constant 0 : i32
    %c0_i32_0 = arith.constant 0 : i32
    return %c0_i32 : i32
  }
  func.func @transform_3(%arg0: i32) -> i32 {
    %c0_i32 = arith.constant 0 : i32
    %c0_i32_0 = arith.constant 0 : i32
    return %c0_i32 : i32
  }
  func.func @transform_4(%arg0: i32) -> (i32, i32) {
    %c0_i32 = arith.constant 0 : i32
    %c0_i32_0 = arith.constant 0 : i32
    %c0_i32_1 = arith.constant 0 : i32
    return %c0_i32, %c0_i32_0 : i32, i32
  }
  func.func @transform_5(%arg0: i32) -> (i32, i32, i32, i32) {
    %c0_i32 = arith.constant 0 : i32
    %c0_i32_0 = arith.constant 0 : i32
    %c0_i32_1 = arith.constant 0 : i32
    %c0_i32_2 = arith.constant 0 : i32
    return %c0_i32, %arg0, %c0_i32_0, %c0_i32_1 : i32, i32, i32, i32
  }
}

</mosaic_0001>

<bundles_post_ra>
// kernel: st_meta_learner_forward.1
= control target key start
LH: loop header
LB: loop body
LE: loop exit
PB: predicated region body
PF: predicated region fallthrough
CT: control target
= control target key end

     0   :  { %10 = vsyncpa [#allocation4], 0  ;;  %s2824_s0 = inlined_call_operand.vmem [shape: bf16[32,2,8,128], index: 0, kind: input, shape index: {}]   ;;  %s2825_s1 = inlined_call_operand.vmem [shape: f32[12], index: 1, kind: input, shape index: {}]   ;;  %s2826_s2 = inlined_call_operand.vmem [shape: f32[3], index: 2, kind: input, shape index: {}]   ;;  %s2827_s3 = inlined_call_operand.vmem [shape: f32[4], index: 3, kind: input, shape index: {}]   ;;  %s2828_s4 = inlined_call_operand.vmem [shape: f32[256,72], index: 4, kind: input, shape index: {}]   ;;  %s2829_s5 = inlined_call_operand.vmem [shape: f32[32,2,8,128], index: 5, kind: output, shape index: {}]  }
   0x1   :  { %11 = vsyncpa [#allocation6], 0  ;;  %s2187_s18 = smov 0   ;;  %s2189_s19 = smov 0  }
   0x2   :  { %s2191_s20 = smov 0  }
   0x3 LB: > { %s2203_s21 = sadd.s32 4294967295, %s2151_s20   ;;  %s2206_s22 = sadd.s32 1, %s2151_s20   ;;  %s2151_s20 = sphi %s2191_s20, %s2845_s20   ;;  %s2147_s19 = sphi %s2189_s19, %s2844_s19   ;;  %s2143_s18 = sphi %s2187_s18, %s2843_s18  }
   0x4   : > { %s21_s23 = ssub.s32 %s2151_s20, %s2206_s22  ;;  %s24_s24 = sadd.s32 1, %s2147_s19 }
   0x5   : > { %p22_p0 = scmp.eq.s32.totalorder %s21_s23, 0  ;;  %p31_p1 = scmp.ne.s32.totalorder %s2147_s19, %s2143_s18 }
   0x6   : > { %p32_p2 = scmp.eq.s32.totalorder %s2151_s20, 0  ;;  %p145_p3 = scmp.eq.s32.totalorder %s2203_s21, 1 }
   0x7   : > { %s2216_s25 = scalar_select %p22_p0, %s2147_s19, %s24_s24  }
   0x8   : > { %p2218_p4 = por %p32_p2, %p31_p1  ;;  %p2222_p5 = por %p145_p3, %p31_p1 }
   0x9   : > { %p1646_p6 = scmp.ge.s32.totalorder %s2151_s20, 1  ;;  %p158_p7 = scmp.lt.s32.totalorder %s2151_s20, 3 }
   0xa   : > { %s2832_s26 = scalar_select %p2218_p4, 1, 0 }
   0xb   : > { %s2833_s27 = scalar_select %p2222_p5, 1, 0 }
   0xc   : > { %p2830_p8 = scmp.eq.s32.totalorder %s2203_s21, 0  ;;  %p2229_p9 = pnand %p1646_p6, %p158_p7 }
   0xd   : > { %s182_s6 = sshll.u32 %s2826_s2, 4  ;;  %s171_s9 = sshll.u32 %s2825_s1, 4  ;;  %s183_s6 = int_to_ptr.vmem [resolvable:$true] %s182_s6  ;;  %s172_s9 = int_to_ptr.vmem [resolvable:$true] %s171_s9 }
   0xe   : > { %s2834_s28 = scalar_select %p2229_p9, 1, 0 }
   0xf   : > { %p1952_p10 = pneg %p2229_p9  ;;  %s193_s13 = sshll.u32 %s2827_s3, 4  ;;  %s2250_s13 = int_to_ptr.vmem [resolvable:$true] %s193_s13 }
  0x10   : > { %s2076_s14 = scalar_lea.vmem %s183_s6, 16  ;;  %p2084_p2 = scmp.lt.s32.totalorder %s183_s6, %s183_s6 }
  0x11   : > { %p2243_p11 = pnand %p2830_p8, %p1952_p10  ;;  %p2077_p12 = scmp.ne.s32.totalorder %s183_s6, %s2076_s14 }
  0x12   : > { %p2085_p3 = scmp.lt.s32.totalorder %s2076_s14, %s2076_s14 }
  0x13   : > { %p2078_p13 = pneg %p2243_p11 }
  0x14   : > { %p2086_p6 = por %p2085_p3, %p2084_p2 }
  0x15   : > { %p2079_p0 = pnand %p2078_p13, %p2077_p12 }
  0x17   : > { %p2080_p1 = pneg %p2079_p0 }
  0x19   : > { %p2087_p7 = pnand %p2086_p6, %p2080_p1 }
  0x1b   : > { %2090 = shalt.err (!%p2087_p7)
}
  0x1c   : > { %s2153_s15 = smov [#allocation5]   ;;  %s2091_s16 = scalar_lea.vmem %s172_s9, 16 }
  0x1d   : > { %1958 = dma.vmem_to_smem (!%p2243_p11), %s183_s6, 16, %s2153_s15, [#allocation6]  }
  0x1e   : > { %p2092_p10 = scmp.ne.s32.totalorder %s172_s9, %s2091_s16  ;;  %p2099_p9 = scmp.lt.s32.totalorder %s172_s9, %s172_s9 }
  0x1f   : > { %p2100_p4 = scmp.lt.s32.totalorder %s2091_s16, %s2091_s16 }
  0x20   : > { %p2094_p8 = pnand %p2092_p10, %p2078_p13 }
  0x21   : > { %p2101_p12 = por %p2100_p4, %p2099_p9 }
  0x22   : > { %p2095_p5 = pneg %p2094_p8 }
  0x24   : > { %p2102_p0 = pnand %p2101_p12, %p2095_p5 }
  0x26   : > { %2105 = shalt.err (!%p2102_p0)
}
  0x27   : > { %s2154_s17 = smov [#allocation3]   ;;  %s2106_s23 = scalar_lea.vmem %s2250_s13, 16 }
  0x28   : > { %1955 = dma.vmem_to_smem (!%p2243_p11), %s172_s9, 16, %s2154_s17, [#allocation4]  }
  0x29   : > { %p2107_p1 = scmp.ne.s32.totalorder %s2250_s13, %s2106_s23  ;;  %p2114_p8 = scmp.lt.s32.totalorder %s2250_s13, %s2250_s13 }
  0x2a   : > { %p2115_p6 = scmp.lt.s32.totalorder %s2106_s23, %s2106_s23 }
  0x2b   : > { %p2109_p2 = pnand %p2107_p1, %p2078_p13 }
  0x2c   : > { %p2116_p4 = por %p2115_p6, %p2114_p8 }
  0x2d   : > { %p2110_p3 = pneg %p2109_p2 }
  0x2f   : > { %p2117_p5 = pnand %p2116_p4, %p2110_p3 }
  0x31   : > { %2120 = shalt.err (!%p2117_p5)
}
  0x32   : > { %s2155_s24 = smov [#allocation7]   ;;  %p1650_p9 = scmp.ge.s32.totalorder %s2151_s20, 2 }
  0x33   : > { %1961 = dma.vmem_to_smem (!%p2243_p11), %s2250_s13, 16, %s2155_s24, [#allocation6]  }
  0x34   : > { %203 = sbr.rel (%p1650_p9) target bundleno = 84 (0x54), region = 32  ;;  %p2836_p7 = scmp.ne.s32.totalorder (!%p1650_p9), %s2832_s26, 0 }
  0x3b   : > { %206 = sbr.rel (!%p2836_p7) target bundleno = 84 (0x54), region = 36  ;;  %s208_s29 = sand.u32 (%p2836_p7), 1, %s2147_s19  }
  0x3c   : > { %s1652_s30 = sshll.u32 (%p2836_p7), %s2151_s20, 2  ;;  %s1651_s6 = sshll.u32 (%p2836_p7), %s208_s29, 7 }
  0x3d   : > { %s2282_s9 = scalar_lea.vmem (%p2836_p7), %s2824_s0, %s1652_s30  ;;  %s2286_s26 = scalar_lea.vmem (%p2836_p7), [#allocation2], %s1651_s6 }
  0x3e   : > { %v228_v0 = vld [vmem:[%s2282_s9] sm:$0xf] (%p2836_p7)  ;;  %v230_v1 = vld [vmem:[%s2282_s9 + $0x8] sm:$0xf] (%p2836_p7)  ;;  %v232_v2 = vld [vmem:[%s2282_s9 + $0x10] sm:$0xf] (%p2836_p7) }
  0x3f   : > { %229 = vst [vmem:[%s2286_s26] sm:$0xf] (%p2836_p7), %v228_v0  ;;  %231 = vst [vmem:[%s2286_s26 + $0x4] sm:$0xf] (%p2836_p7), %v230_v1  ;;  %v234_v3 = vld [vmem:[%s2282_s9 + $0x18] sm:$0xf] (%p2836_p7) }
  0x40   : > { %v236_v4 = vld [vmem:[%s2282_s9 + $0x20] sm:$0xf] (%p2836_p7)  ;;  %233 = vst [vmem:[%s2286_s26 + $0x8] sm:$0xf] (%p2836_p7), %v232_v2  ;;  %235 = vst [vmem:[%s2286_s26 + $0xc] sm:$0xf] (%p2836_p7), %v234_v3 }
  0x41   : > { %237 = vst [vmem:[%s2286_s26 + $0x10] sm:$0xf] (%p2836_p7), %v236_v4  ;;  %v238_v5 = vld [vmem:[%s2282_s9 + $0x28] sm:$0xf] (%p2836_p7)  ;;  %v240_v6 = vld [vmem:[%s2282_s9 + $0x30] sm:$0xf] (%p2836_p7) }
  0x42   : > { %v242_v7 = vld [vmem:[%s2282_s9 + $0x38] sm:$0xf]  ;;  %239 = vst [vmem:[%s2286_s26 + $0x14] sm:$0xf] %v238_v5  ;;  %241 = vst [vmem:[%s2286_s26 + $0x18] sm:$0xf] %v240_v6 }
  0x43   : > { %243 = vst [vmem:[%s2286_s26 + $0x1c] sm:$0xf] %v242_v7  ;;  %v244_v8 = vld [vmem:[%s2282_s9 + $0x40] sm:$0xf]  ;;  %v246_v9 = vld [vmem:[%s2282_s9 + $0x48] sm:$0xf] }
  0x44   : > { %v248_v10 = vld [vmem:[%s2282_s9 + $0x50] sm:$0xf]  ;;  %245 = vst [vmem:[%s2286_s26 + $0x20] sm:$0xf] %v244_v8  ;;  %247 = vst [vmem:[%s2286_s26 + $0x24] sm:$0xf] %v246_v9 }
  0x45   : > { %249 = vst [vmem:[%s2286_s26 + $0x28] sm:$0xf] %v248_v10  ;;  %v250_v11 = vld [vmem:[%s2282_s9 + $0x58] sm:$0xf]  ;;  %v252_v12 = vld [vmem:[%s2282_s9 + $0x60] sm:$0xf] }
  0x46   : > { %v254_v13 = vld [vmem:[%s2282_s9 + $0x68] sm:$0xf]  ;;  %251 = vst [vmem:[%s2286_s26 + $0x2c] sm:$0xf] %v250_v11  ;;  %253 = vst [vmem:[%s2286_s26 + $0x30] sm:$0xf] %v252_v12 }
  0x47   : > { %255 = vst [vmem:[%s2286_s26 + $0x34] sm:$0xf] %v254_v13  ;;  %v256_v14 = vld [vmem:[%s2282_s9 + $0x70] sm:$0xf]  ;;  %v258_v15 = vld [vmem:[%s2282_s9 + $0x78] sm:$0xf] }
  0x48   : > { %v260_v16 = vld [vmem:[%s2282_s9 + $0x80] sm:$0xf]  ;;  %257 = vst [vmem:[%s2286_s26 + $0x38] sm:$0xf] %v256_v14  ;;  %259 = vst [vmem:[%s2286_s26 + $0x3c] sm:$0xf] %v258_v15 }
  0x49   : > { %261 = vst [vmem:[%s2286_s26 + $0x40] sm:$0xf] %v260_v16  ;;  %v262_v17 = vld [vmem:[%s2282_s9 + $0x88] sm:$0xf]  ;;  %v264_v18 = vld [vmem:[%s2282_s9 + $0x90] sm:$0xf] }
  0x4a   : > { %v266_v19 = vld [vmem:[%s2282_s9 + $0x98] sm:$0xf]  ;;  %263 = vst [vmem:[%s2286_s26 + $0x44] sm:$0xf] %v262_v17  ;;  %265 = vst [vmem:[%s2286_s26 + $0x48] sm:$0xf] %v264_v18 }
  0x4b   : > { %267 = vst [vmem:[%s2286_s26 + $0x4c] sm:$0xf] %v266_v19  ;;  %v268_v20 = vld [vmem:[%s2282_s9 + $0xa0] sm:$0xf]  ;;  %v270_v21 = vld [vmem:[%s2282_s9 + $0xa8] sm:$0xf] }
  0x4c   : > { %v272_v22 = vld [vmem:[%s2282_s9 + $0xb0] sm:$0xf]  ;;  %269 = vst [vmem:[%s2286_s26 + $0x50] sm:$0xf] %v268_v20  ;;  %271 = vst [vmem:[%s2286_s26 + $0x54] sm:$0xf] %v270_v21 }
  0x4d   : > { %273 = vst [vmem:[%s2286_s26 + $0x58] sm:$0xf] %v272_v22  ;;  %v274_v23 = vld [vmem:[%s2282_s9 + $0xb8] sm:$0xf]  ;;  %v276_v24 = vld [vmem:[%s2282_s9 + $0xc0] sm:$0xf] }
  0x4e   : > { %v278_v25 = vld [vmem:[%s2282_s9 + $0xc8] sm:$0xf]  ;;  %275 = vst [vmem:[%s2286_s26 + $0x5c] sm:$0xf] %v274_v23  ;;  %277 = vst [vmem:[%s2286_s26 + $0x60] sm:$0xf] %v276_v24 }
  0x4f   : > { %279 = vst [vmem:[%s2286_s26 + $0x64] sm:$0xf] %v278_v25  ;;  %v280_v26 = vld [vmem:[%s2282_s9 + $0xd0] sm:$0xf]  ;;  %v282_v27 = vld [vmem:[%s2282_s9 + $0xd8] sm:$0xf] }
  0x50   : > { %v284_v28 = vld [vmem:[%s2282_s9 + $0xe0] sm:$0xf]  ;;  %281 = vst [vmem:[%s2286_s26 + $0x68] sm:$0xf] %v280_v26  ;;  %283 = vst [vmem:[%s2286_s26 + $0x6c] sm:$0xf] %v282_v27 }
  0x51   : > { %285 = vst [vmem:[%s2286_s26 + $0x70] sm:$0xf] %v284_v28  ;;  %v286_v29 = vld [vmem:[%s2282_s9 + $0xe8] sm:$0xf]  ;;  %v288_v30 = vld [vmem:[%s2282_s9 + $0xf0] sm:$0xf] }
  0x52   : > { %v290_v31 = vld [vmem:[%s2282_s9 + $0xf8] sm:$0xf]  ;;  %287 = vst [vmem:[%s2286_s26 + $0x74] sm:$0xf] %v286_v29  ;;  %289 = vst [vmem:[%s2286_s26 + $0x78] sm:$0xf] %v288_v30 }
  0x53   : > { %291 = vst [vmem:[%s2286_s26 + $0x7c] sm:$0xf] %v290_v31 }
  0x54 PF: > { %p2837_p11 = scmp.ne.s32.totalorder %s2834_s28, 0 }
  0x55   : > { %s384_s20 = sand.u32 (!%p2837_p11), 1, %s2143_s18   ;;  %p2838_p13 = scmp.eq.s32.totalorder (!%p2837_p11), %s2203_s21, 0 }
  0x56   : > { %381 = sbr.rel (%p2837_p11) target bundleno = 783 (0x30f), region = 77  ;;  %s1654_s10 = sshll.u32 (!%p2837_p11), %s384_s20, 7 }
  0x57   : > { %s2355_s11 = scalar_lea.vmem (!%p2837_p11), [#allocation2], %s1654_s10 }
  0x5d   : > { %2134 = dma.done.wait (%p2838_p13), [#allocation4], 16   ;;  %p2839_p10 = pmov %p2838_p13 }
  0x5f   : > { %2136 = vsyncadd (%p2839_p10), [#allocation4], 4294967280  ;;  %p2840_p12 = pmov %p2839_p10 }
  0x60   : > { %p2841_p0 = pmov %p2839_p10 }
  0x61   : > { %2138 = dma.done.wait (%p2840_p12), [#allocation6], 32  }
  0x62   : > { %2140 = vsyncadd (%p2841_p0), [#allocation6], 4294967264 }
  0x63   : > { %402 = sfence }
  0x64   : > { %s423_s28 = sld [smem:[#allocation7]]  ;;  %s1659_s12 = sld [smem:[#allocation7 + $0x1]]  ;;  %v431_v32 = vld [vmem:[%s2355_s11] sm:$0xff]   ;;  %v1668_v35 = vld [vmem:[%s2355_s11 + $0x8] sm:$0xff]   ;;  %v1680_v27 = vld [vmem:[%s2355_s11 + $0x10] sm:$0xff]   ;;  %vm956_vm0 = vcmask 588800  }
  0x65   : > { %s433_s13 = sld [smem:[#allocation3]]  ;;  %s1662_s14 = sld [smem:[#allocation3 + $0x4]]  ;;  %v432_v33 = vunpack.c.l.bf16 %v431_v32  ;;  %v447_v34 = vunpack.c.h.bf16 %v431_v32  ;;  %v462_v43 = vunpack.c.l.bf16 %v1668_v35  ;;  %v477_v49 = vunpack.c.h.bf16 %v1668_v35 }
  0x66   : > { %s1665_s15 = sld [smem:[#allocation3 + $0x1]]  ;;  %s1666_s16 = sld [smem:[#allocation3 + $0x5]]  ;;  %v522_v31 = vunpack.c.l.bf16 %v1680_v27  ;;  %v531_v35 = vunpack.c.h.bf16 %v1680_v27 }
  0x67   : > { %s1669_s17 = sld [smem:[#allocation3 + $0x2]]  ;;  %s1670_s23 = sld [smem:[#allocation3 + $0x6]] }
  0x68   : > { %s1673_s24 = sld [smem:[#allocation3 + $0x3]]  ;;  %s1674_s29 = sld [smem:[#allocation3 + $0x7]] }
  0x69   : > { %s490_s30 = sld [smem:[#allocation5]]  ;;  %s1677_s6 = sld [smem:[#allocation5 + $0x1]] }
  0x6a   : > { %v2367_v36 = vstv %s423_s28  ;;  %v2369_v37 = vstv %s1659_s12  ;;  %s1663_s7 = sld [smem:[#allocation3 + $0x8]]  ;;  %s1660_s8 = sld [smem:[#allocation7 + $0x2]] }
  0x6b   : > { %v2371_v38 = vstv %s433_s13  ;;  %v2373_v39 = vstv %s1662_s14  ;;  %s1667_s9 = sld [smem:[#allocation3 + $0x9]]  ;;  %s1671_s26 = sld [smem:[#allocation3 + $0xa]] }
  0x6c   : > { %v435_v40 = vmul.f32 %v2371_v38, %v432_v33  ;;  %v439_v41 = vmul.f32 %v2373_v39, %v432_v33  ;;  %v2377_v42 = vstv %s1665_s15  ;;  %v2380_v45 = vstv %s1666_s16  ;;  %s1679_s10 = sld [smem:[#allocation5 + $0x2]]  ;;  %s1675_s28 = sld [smem:[#allocation3 + $0xb]] }
  0x6d   : > { %v450_v44 = vmul.f32 %v2377_v42, %v447_v34  ;;  %v454_v48 = vmul.f32 %v2380_v45, %v447_v34  ;;  %v2385_v50 = vstv %s1669_s17  ;;  %v2387_v51 = vstv %s1670_s23  ;;  %s1661_s12 = sld [smem:[#allocation7 + $0x3]]  ;;  %p2842_p1 = scmp.ne.s32.totalorder %s2833_s27, 0 }
  0x6e   : > { %v436_v46 = vadd.f32 %v435_v40, %v2367_v36  ;;  %v440_v47 = vadd.f32 %v439_v41, %v2369_v37  ;;  %v465_v54 = vmul.f32 %v2385_v50, %v462_v43  ;;  %v469_v55 = vmul.f32 %v2387_v51, %v462_v43  ;;  %v1682_v40 = vld [vmem:[%s2355_s11 + $0x18] sm:$0xff]   ;;  %s1771_s18 = sshll.u32 (%p2842_p1), %s2203_s21, 3 }
  0x6f   : > { %v2391_v56 = vstv %s1673_s24  ;;  %v2393_v57 = vstv %s1674_s29  ;;  %v2396_v60 = vstv %s490_s30  ;;  %v2400_v1 = vstv %s1677_s6  ;;  %s1658_s6 = sshll.u32 %s384_s20, 8 }
  0x70   : > { %v451_v52 = vadd.f32 %v450_v44, %v436_v46  ;;  %v455_v53 = vadd.f32 %v454_v48, %v440_v47  ;;  %v480_v59 = vmul.f32 %v2391_v56, %v477_v49  ;;  %v484_v63 = vmul.f32 %v2393_v57, %v477_v49 }
  0x71   : > { %v492_v0 = vmul.f32 0.0, %v2396_v60  ;;  %v502_v5 = vmul.f32 0.0, %v2400_v1  ;;  %v2403_v7 = vstv %s1663_s7  ;;  %v2406_v10 = vstv %s1660_s8  ;;  %s2708_s7 = scalar_lea.vmem [#allocation8], %s1658_s6 }
  0x72   : > { %v466_v58 = vadd.f32 %v465_v54, %v451_v52  ;;  %v470_v61 = vadd.f32 %v469_v55, %v455_v53  ;;  %v443_v8 = vmul.f32 %v2403_v7, %v432_v33  ;;  %v2408_v11 = vstv %s1667_s9  ;;  %s2751_s9 = scalar_lea.vmem (%p2842_p1), %s2829_s5, %s1771_s18 }
  0x73   : > { %v458_v14 = vmul.f32 %v2408_v11, %v447_v34  ;;  %v2412_v15 = vstv %s1671_s26  ;;  %v2414_v17 = vstv %s1679_s10  ;;  %v2417_v20 = vstv %s1675_s28 }
  0x74   : > { %v481_v62 = vadd.f32 %v480_v59, %v466_v58  ;;  %v485_v3 = vadd.f32 %v484_v63, %v470_v61  ;;  %v444_v13 = vadd.f32 %v443_v8, %v2406_v10  ;;  %v473_v19 = vmul.f32 %v2412_v15, %v462_v43 }
  0x75   : > { %v512_v21 = vmul.f32 0.0, %v2414_v17  ;;  %v2420_v22 = vstv %s1661_s12  ;;  %v488_v24 = vmul.f32 %v2417_v20, %v477_v49  ;;  %v523_v34 = vmul.f32 %v522_v31, %v2371_v38 }
  0x76   : > { %v493_v2 = vadd.f32 %v492_v0, %v481_v62  ;;  %v503_v6 = vadd.f32 %v502_v5, %v485_v3  ;;  %v459_v18 = vadd.f32 %v458_v14, %v444_v13  ;;  %v532_v43 = vmul.f32 %v531_v35, %v2377_v42 }
  0x77   : > { %v513_v26 = vadd.f32 %v512_v21, %v2420_v22  ;;  %v524_v41 = vadd.f32 %v523_v34, %v2367_v36  ;;  %v540_v44 = vunpack.c.l.bf16 %v1682_v40  ;;  %v525_v46 = vmul.f32 %v522_v31, %v2373_v39 }
  0x78   : > { %v1676_v4 = vmul.f32 -1.442695, %v493_v2  ;;  %v1678_v9 = vmul.f32 -1.442695, %v503_v6  ;;  %v474_v23 = vadd.f32 %v473_v19, %v459_v18  ;;  %v549_v49 = vunpack.c.h.bf16 %v1682_v40 }
  0x79   : > { %v533_v47 = vadd.f32 %v532_v43, %v524_v41  ;;  %v541_v48 = vmul.f32 %v540_v44, %v2385_v50  ;;  %v526_v53 = vadd.f32 %v525_v46, %v2369_v37  ;;  %v534_v54 = vmul.f32 %v531_v35, %v2380_v45 }
  0x7a   : > { %1996 = vpow2.f32 %v1676_v4  ;;  %v489_v28 = vadd.f32 %v488_v24, %v474_v23  ;;  %v550_v61 = vmul.f32 %v549_v49, %v2391_v56  ;;  %v543_v0 = vmul.f32 %v540_v44, %v2387_v51 }
  0x7b   : > { %1998 = vpow2.f32 %v1678_v9  ;;  %v542_v59 = vadd.f32 %v541_v48, %v533_v47  ;;  %v535_v63 = vadd.f32 %v534_v54, %v526_v53  ;;  %v552_v5 = vmul.f32 %v549_v49, %v2393_v57  ;;  %v1688_v47 = vld [vmem:[%s2355_s11 + $0x28] sm:$0xff]  }
  0x7c   : > { %v536_v23 = vmul.f32 %v531_v35, %v2408_v11 }
  0x7d   : > { %v551_v3 = vadd.f32 %v550_v61, %v542_v59  ;;  %v544_v4 = vadd.f32 %v543_v0, %v535_v63 }
  0x7f   : > { %v553_v9 = vadd.f32 %v552_v5, %v544_v4 }
  0x84   : > { %v1997_v12 = vpop.eup %1996 }
  0x85   : > { %v497_v16 = vadd.f32 1.0, %v1997_v12  ;;  %v1999_v25 = vpop.eup %1998 }
  0x86   : > { %v507_v30 = vadd.f32 1.0, %v1999_v25 }
  0x87   : > { %2000 = vrcp.f32 %v497_v16  ;;  %v527_v16 = vmul.f32 %v522_v31, %v2403_v7 }
  0x88   : > { %2002 = vrcp.f32 %v507_v30 }
  0x89   : > { %v528_v21 = vadd.f32 %v527_v16, %v2406_v10 }
  0x8b   : > { %v537_v25 = vadd.f32 %v536_v23, %v528_v21 }
  0x91   : > { %v2001_v29 = vpop.eup %2000 }
  0x92   : > { %v514_v32 = vmul.f32 %v2001_v29, %v513_v26  ;;  %v2003_v52 = vpop.eup %2002  ;;  %v545_v26 = vmul.f32 %v540_v44, %v2412_v15  ;;  %v554_v29 = vmul.f32 %v549_v49, %v2417_v20 }
  0x94   : > { %v515_v33 = vadd.f32 %v514_v32, %v489_v28  ;;  %v546_v28 = vadd.f32 %v545_v26, %v537_v25  ;;  %v1686_v32 = vld [vmem:[%s2355_s11 + $0x20] sm:$0xff]  }
  0x95   : > { %v582_v35 = vunpack.c.l.bf16 %v1686_v32  ;;  %v591_v44 = vunpack.c.h.bf16 %v1686_v32 }
  0x96   : > { %2004 = vtanh.f32 %v515_v33  ;;  %v555_v33 = vadd.f32 %v554_v29, %v546_v28 }
  0x97   : > { %v583_v46 = vmul.f32 %v582_v35, %v2371_v38  ;;  %v592_v49 = vmul.f32 %v591_v44, %v2377_v42  ;;  %v585_v53 = vmul.f32 %v582_v35, %v2373_v39 }
  0x99   : > { %v584_v48 = vadd.f32 %v583_v46, %v2367_v36  ;;  %v586_v61 = vadd.f32 %v585_v53, %v2369_v37 }
  0x9b   : > { %v593_v54 = vadd.f32 %v592_v49, %v584_v48 }
  0xa0   : > { %v2005_v55 = vpop.eup %2004 }
  0xa1   : > { %v517_v58 = vsub.f32 0.0, %v2005_v55 }
  0xa3   : > { %v518_v62 = vmul.f32 %v2003_v52, %v517_v58  ;;  %v600_v52 = vunpack.c.l.bf16 %v1688_v47  ;;  %v609_v58 = vunpack.c.h.bf16 %v1688_v47 }
  0xa5   : > { %v519_v2 = vadd.f32 %v2005_v55, %v518_v62  ;;  %v601_v55 = vmul.f32 %v600_v52, %v2385_v50  ;;  %v594_v62 = vmul.f32 %v591_v44, %v2380_v45  ;;  %v610_v4 = vmul.f32 %v609_v58, %v2391_v56 }
  0xa6   : > { %v605_v32 = vmul.f32 %v600_v52, %v2412_v15 }
  0xa7   : > { %v556_v6 = vmul.f32 %v519_v2, %v2396_v60  ;;  %v564_v13 = vmul.f32 %v519_v2, %v2400_v1  ;;  %v572_v27 = vmul.f32 %v519_v2, %v2414_v17 }
  0xa9   : > { %v557_v8 = vadd.f32 %v556_v6, %v551_v3  ;;  %v565_v14 = vadd.f32 %v564_v13, %v553_v9  ;;  %v573_v31 = vadd.f32 %v572_v27, %v2420_v22  ;;  %v602_v3 = vadd.f32 %v601_v55, %v593_v54  ;;  %v1694_v55 = vld [vmem:[%s2355_s11 + $0x38] sm:$0xff]  }
  0xaa   : > { %v595_v6 = vadd.f32 %v594_v62, %v586_v61  ;;  %v587_v27 = vmul.f32 %v582_v35, %v2403_v7  ;;  %v660_v61 = vunpack.c.l.bf16 %v1694_v55 }
  0xab   : > { %v1684_v12 = vmul.f32 -1.442695, %v557_v8  ;;  %v1685_v18 = vmul.f32 -1.442695, %v565_v14  ;;  %v603_v8 = vmul.f32 %v600_v52, %v2387_v51  ;;  %v612_v14 = vmul.f32 %v609_v58, %v2393_v57 }
  0xac   : > { %v588_v29 = vadd.f32 %v587_v27, %v2406_v10 }
  0xad   : > { %2006 = vpow2.f32 %v1684_v12  ;;  %v611_v12 = vadd.f32 %v610_v4, %v602_v3  ;;  %v604_v13 = vadd.f32 %v603_v8, %v595_v6  ;;  %v669_v3 = vunpack.c.h.bf16 %v1694_v55 }
  0xae   : > { %2008 = vpow2.f32 %v1685_v18 }
  0xaf   : > { %v613_v21 = vadd.f32 %v612_v14, %v604_v13  ;;  %v670_v14 = vmul.f32 %v669_v3, %v2391_v56 }
  0xb7   : > { %v2007_v19 = vpop.eup %2006 }
  0xb8   : > { %v561_v24 = vadd.f32 1.0, %v2007_v19  ;;  %v2009_v30 = vpop.eup %2008 }
  0xb9   : > { %v569_v40 = vadd.f32 1.0, %v2009_v30 }
  0xba   : > { %2010 = vrcp.f32 %v561_v24 }
  0xbb   : > { %2012 = vrcp.f32 %v569_v40  ;;  %v614_v40 = vmul.f32 %v609_v58, %v2417_v20 }
  0xc4   : > { %v2011_v34 = vpop.eup %2010 }
  0xc5   : > { %v574_v41 = vmul.f32 %v2011_v34, %v573_v31  ;;  %v2013_v59 = vpop.eup %2012 }
  0xc7   : > { %v575_v43 = vadd.f32 %v574_v41, %v555_v33 }
  0xc9   : > { %2014 = vtanh.f32 %v575_v43  ;;  %v1692_v43 = vld [vmem:[%s2355_s11 + $0x30] sm:$0xff]  }
  0xca   : > { %v642_v49 = vunpack.c.l.bf16 %v1692_v43  ;;  %v651_v52 = vunpack.c.h.bf16 %v1692_v43 }
  0xcc   : > { %v643_v54 = vmul.f32 %v642_v49, %v2371_v38  ;;  %v652_v58 = vmul.f32 %v651_v52, %v2377_v42  ;;  %v645_v62 = vmul.f32 %v642_v49, %v2373_v39  ;;  %v654_v6 = vmul.f32 %v651_v52, %v2380_v45 }
  0xd3   : > { %v2015_v63 = vpop.eup %2014 }
  0xd4   : > { %v577_v0 = vsub.f32 %v519_v2, %v2015_v63 }
  0xd6   : > { %v578_v5 = vmul.f32 %v2013_v59, %v577_v0  ;;  %v644_v59 = vadd.f32 %v643_v54, %v2367_v36  ;;  %v661_v0 = vmul.f32 %v660_v61, %v2385_v50 }
  0xd8   : > { %v579_v9 = vadd.f32 %v2015_v63, %v578_v5  ;;  %v653_v63 = vadd.f32 %v652_v58, %v644_v59  ;;  %v646_v5 = vadd.f32 %v645_v62, %v2369_v37 }
  0xda   : > { %v616_v16 = vmul.f32 %v579_v9, %v2396_v60  ;;  %v1908_v18 = vpack.c.bf16 %v579_v9, %v519_v2  ;;  %v624_v24 = vmul.f32 %v579_v9, %v2400_v1  ;;  %v596_v2 = vmul.f32 %v591_v44, %v2408_v11 }
  0xdb   : > { %v632_v33 = vmul.f32 %v579_v9, %v2414_v17  ;;  %v662_v13 = vadd.f32 %v661_v0, %v653_v63  ;;  %v1700_v63 = vld [vmem:[%s2355_s11 + $0x48] sm:$0xff]  }
  0xdc   : > { %v617_v19 = vadd.f32 %v616_v16, %v611_v12  ;;  %1909 = vmatprep.subr.bf16.mxu0 %v1908_v18  ;;  %1925 = vmatprep.subr.bf16.mxu1 %v1908_v18  ;;  %v625_v25 = vadd.f32 %v624_v24, %v613_v21  ;;  %v597_v31 = vadd.f32 %v596_v2, %v588_v29 }
  0xdd   : > { %1911 = vmatpush3.bf16.msra.mxu0 %v1908_v18  ;;  %1927 = vmatpush3.bf16.msra.mxu1 %v1908_v18  ;;  %v633_v35 = vadd.f32 %v632_v33, %v2420_v22  ;;  %v655_v18 = vadd.f32 %v654_v6, %v646_v5 }
  0xde   : > { %v1690_v23 = vmul.f32 -1.442695, %v617_v19  ;;  %v1691_v26 = vmul.f32 -1.442695, %v625_v25  ;;  %v606_v34 = vadd.f32 %v605_v32, %v597_v31  ;;  %v663_v19 = vmul.f32 %v660_v61, %v2387_v51 }
  0xdf   : > { %v672_v25 = vmul.f32 %v669_v3, %v2393_v57 }
  0xe0   : > { %2016 = vpow2.f32 %v1690_v23  ;;  %v615_v46 = vadd.f32 %v614_v40, %v606_v34  ;;  %v671_v23 = vadd.f32 %v670_v14, %v662_v13  ;;  %v664_v24 = vadd.f32 %v663_v19, %v655_v18 }
  0xe1   : > { %2018 = vpow2.f32 %v1691_v26  ;;  %v656_v34 = vmul.f32 %v651_v52, %v2408_v11 }
  0xea   : > { %v2017_v28 = vpop.eup %2016 }
  0xeb   : > { %v621_v30 = vadd.f32 1.0, %v2017_v28  ;;  %v2019_v41 = vpop.eup %2018  ;;  %v673_v28 = vadd.f32 %v672_v25, %v664_v24 }
  0xec   : > { %v629_v48 = vadd.f32 1.0, %v2019_v41 }
  0xed   : > { %2020 = vrcp.f32 %v621_v30  ;;  %v647_v30 = vmul.f32 %v642_v49, %v2403_v7 }
  0xee   : > { %2022 = vrcp.f32 %v629_v48 }
  0xef   : > { %v648_v33 = vadd.f32 %v647_v30, %v2406_v10 }
  0xf1   : > { %v657_v41 = vadd.f32 %v656_v34, %v648_v33 }
  0xf7   : > { %v2021_v47 = vpop.eup %2020 }
  0xf8   : > { %v634_v44 = vmul.f32 %v2021_v47, %v633_v35  ;;  %v2023_v4 = vpop.eup %2022  ;;  %v665_v35 = vmul.f32 %v660_v61, %v2412_v15  ;;  %v674_v47 = vmul.f32 %v669_v3, %v2417_v20 }
  0xfa   : > { %v635_v53 = vadd.f32 %v634_v44, %v615_v46  ;;  %v666_v46 = vadd.f32 %v665_v35, %v657_v41  ;;  %v1698_v44 = vld [vmem:[%s2355_s11 + $0x40] sm:$0xff]  }
  0xfb   : > { %v702_v52 = vunpack.c.l.bf16 %v1698_v44  ;;  %v711_v61 = vunpack.c.h.bf16 %v1698_v44 }
  0xfc   : > { %2024 = vtanh.f32 %v635_v53  ;;  %v675_v53 = vadd.f32 %v674_v47, %v666_v46 }
  0xfd   : > { %v703_v62 = vmul.f32 %v702_v52, %v2371_v38  ;;  %v712_v3 = vmul.f32 %v711_v61, %v2377_v42  ;;  %v705_v5 = vmul.f32 %v702_v52, %v2373_v39 }
  0xff   : > { %v704_v0 = vadd.f32 %v703_v62, %v2367_v36  ;;  %v706_v14 = vadd.f32 %v705_v5, %v2369_v37 }
 0x101   : > { %v713_v6 = vadd.f32 %v712_v3, %v704_v0 }
 0x106   : > { %v2025_v8 = vpop.eup %2024 }
 0x107   : > { %v637_v12 = vsub.f32 %v579_v9, %v2025_v8 }
 0x109   : > { %v638_v16 = vmul.f32 %v2023_v4, %v637_v12  ;;  %v720_v4 = vunpack.c.l.bf16 %v1700_v63  ;;  %v729_v12 = vunpack.c.h.bf16 %v1700_v63 }
 0x10b   : > { %v639_v21 = vadd.f32 %v2025_v8, %v638_v16  ;;  %v721_v8 = vmul.f32 %v720_v4, %v2385_v50  ;;  %v714_v16 = vmul.f32 %v711_v61, %v2380_v45  ;;  %v730_v24 = vmul.f32 %v729_v12, %v2391_v56 }
 0x10c   : > { %v725_v44 = vmul.f32 %v720_v4, %v2412_v15 }
 0x10d   : > { %v676_v26 = vmul.f32 %v639_v21, %v2396_v60  ;;  %v684_v2 = vmul.f32 %v639_v21, %v2400_v1  ;;  %v692_v43 = vmul.f32 %v639_v21, %v2414_v17 }
 0x10f   : > { %v677_v27 = vadd.f32 %v676_v26, %v671_v23  ;;  %v685_v9 = vadd.f32 %v684_v2, %v673_v28  ;;  %v693_v49 = vadd.f32 %v692_v43, %v2420_v22  ;;  %v722_v23 = vadd.f32 %v721_v8, %v713_v6  ;;  %v1706_v8 = vld [vmem:[%s2355_s11 + $0x58] sm:$0xff]  }
 0x110   : > { %v715_v26 = vadd.f32 %v714_v16, %v706_v14  ;;  %v707_v43 = vmul.f32 %v702_v52, %v2403_v7  ;;  %v780_v14 = vunpack.c.l.bf16 %v1706_v8 }
 0x111   : > { %v1696_v29 = vmul.f32 -1.442695, %v677_v27  ;;  %v1697_v31 = vmul.f32 -1.442695, %v685_v9  ;;  %v723_v27 = vmul.f32 %v720_v4, %v2387_v51  ;;  %v732_v9 = vmul.f32 %v729_v12, %v2393_v57 }
 0x112   : > { %v708_v47 = vadd.f32 %v707_v43, %v2406_v10 }
 0x113   : > { %2026 = vpow2.f32 %v1696_v29  ;;  %v731_v29 = vadd.f32 %v730_v24, %v722_v23  ;;  %v724_v2 = vadd.f32 %v723_v27, %v715_v26  ;;  %v789_v23 = vunpack.c.h.bf16 %v1706_v8 }
 0x114   : > { %2028 = vpow2.f32 %v1697_v31 }
 0x115   : > { %v733_v33 = vadd.f32 %v732_v9, %v724_v2  ;;  %v790_v9 = vmul.f32 %v789_v23, %v2391_v56 }
 0x11d   : > { %v2027_v32 = vpop.eup %2026 }
 0x11e   : > { %v681_v40 = vadd.f32 1.0, %v2027_v32  ;;  %v2029_v48 = vpop.eup %2028 }
 0x11f   : > { %v689_v55 = vadd.f32 1.0, %v2029_v48 }
 0x120   : > { %2030 = vrcp.f32 %v681_v40 }
 0x121   : > { %2032 = vrcp.f32 %v689_v55  ;;  %v734_v55 = vmul.f32 %v729_v12, %v2417_v20 }
 0x12a   : > { %v2031_v54 = vpop.eup %2030 }
 0x12b   : > { %v694_v59 = vmul.f32 %v2031_v54, %v693_v49  ;;  %v2033_v13 = vpop.eup %2032 }
 0x12d   : > { %v695_v58 = vadd.f32 %v694_v59, %v675_v53 }
 0x12f   : > { %2034 = vtanh.f32 %v695_v58  ;;  %v1704_v58 = vld [vmem:[%s2355_s11 + $0x50] sm:$0xff]  }
 0x130   : > { %v762_v3 = vunpack.c.l.bf16 %v1704_v58  ;;  %v771_v4 = vunpack.c.h.bf16 %v1704_v58 }
 0x132   : > { %v763_v6 = vmul.f32 %v762_v3, %v2371_v38  ;;  %v772_v12 = vmul.f32 %v771_v4, %v2377_v42  ;;  %v765_v16 = vmul.f32 %v762_v3, %v2373_v39  ;;  %v774_v26 = vmul.f32 %v771_v4, %v2380_v45 }
 0x139   : > { %v2035_v18 = vpop.eup %2034 }
 0x13a   : > { %v697_v19 = vsub.f32 %v639_v21, %v2035_v18 }
 0x13c   : > { %v698_v25 = vmul.f32 %v2033_v13, %v697_v19  ;;  %v764_v13 = vadd.f32 %v763_v6, %v2367_v36  ;;  %v781_v19 = vmul.f32 %v780_v14, %v2385_v50 }
 0x13e   : > { %v699_v28 = vadd.f32 %v2035_v18, %v698_v25  ;;  %v773_v18 = vadd.f32 %v772_v12, %v764_v13  ;;  %v766_v25 = vadd.f32 %v765_v16, %v2369_v37  ;;  %v940_v12 = vld [vmem:[%s2828_s4] sm:$0xff] }
 0x13f   : > { %1842 = vmatprep.mubr.msk.f32.mxu0 %vm956_vm0, %v940_v12 }
 0x140   : > { %v736_v30 = vmul.f32 %v699_v28, %v2396_v60  ;;  %v1912_v31 = vpack.c.bf16 %v699_v28, %v639_v21  ;;  %v744_v40 = vmul.f32 %v699_v28, %v2400_v1  ;;  %v716_v21 = vmul.f32 %v711_v61, %v2408_v11 }
 0x141   : > { %v752_v53 = vmul.f32 %v699_v28, %v2414_v17  ;;  %v782_v2 = vadd.f32 %v781_v19, %v773_v18 }
 0x142   : > { %v737_v32 = vadd.f32 %v736_v30, %v731_v29  ;;  %1913 = vmatprep.subr.bf16.mxu0 %v1912_v31  ;;  %1929 = vmatprep.subr.bf16.mxu1 %v1912_v31  ;;  %v745_v41 = vadd.f32 %v744_v40, %v733_v33  ;;  %v717_v49 = vadd.f32 %v716_v21, %v708_v47 }
 0x143   : > { %1915 = vmatpush3.bf16.msra.mxu0 %v1912_v31  ;;  %1931 = vmatpush3.bf16.msra.mxu1 %v1912_v31  ;;  %v753_v52 = vadd.f32 %v752_v53, %v2420_v22  ;;  %v775_v31 = vadd.f32 %v774_v26, %v766_v25 }
 0x144   : > { %v1702_v34 = vmul.f32 -1.442695, %v737_v32  ;;  %v1703_v35 = vmul.f32 -1.442695, %v745_v41  ;;  %v726_v54 = vadd.f32 %v725_v44, %v717_v49  ;;  %v783_v32 = vmul.f32 %v780_v14, %v2387_v51 }
 0x145   : > { %v792_v41 = vmul.f32 %v789_v23, %v2393_v57 }
 0x146   : > { %2036 = vpow2.f32 %v1702_v34  ;;  %v735_v62 = vadd.f32 %v734_v55, %v726_v54  ;;  %v791_v34 = vadd.f32 %v790_v9, %v782_v2  ;;  %v784_v40 = vadd.f32 %v783_v32, %v775_v31 }
 0x147   : > { %2038 = vpow2.f32 %v1703_v35  ;;  %v776_v54 = vmul.f32 %v771_v4, %v2408_v11 }
 0x150   : > { %v2037_v46 = vpop.eup %2036 }
 0x151   : > { %v741_v48 = vadd.f32 1.0, %v2037_v46  ;;  %v2039_v59 = vpop.eup %2038  ;;  %v793_v46 = vadd.f32 %v792_v41, %v784_v40 }
 0x152   : > { %v749_v0 = vadd.f32 1.0, %v2039_v59 }
 0x153   : > { %2040 = vrcp.f32 %v741_v48  ;;  %v767_v48 = vmul.f32 %v762_v3, %v2403_v7 }
 0x154   : > { %2042 = vrcp.f32 %v749_v0 }
 0x155   : > { %v768_v53 = vadd.f32 %v767_v48, %v2406_v10 }
 0x157   : > { %v777_v59 = vadd.f32 %v776_v54, %v768_v53 }
 0x15d   : > { %v2041_v63 = vpop.eup %2040 }
 0x15e   : > { %v754_v61 = vmul.f32 %v2041_v63, %v753_v52  ;;  %v2043_v24 = vpop.eup %2042  ;;  %v785_v52 = vmul.f32 %v780_v14, %v2412_v15  ;;  %v794_v63 = vmul.f32 %v789_v23, %v2417_v20  ;;  %v1166_v14 = vld [vmem:[%s2828_s4 + $0x80] sm:$0xff]  ;;  %v1712_v23 = vld [vmem:[%s2355_s11 + $0x68] sm:$0xff]  }
 0x15f   : > { %1884 = vmatprep.mubr.msk.f32.mxu1 %vm956_vm0, %v1166_v14  ;;  %v840_v26 = vunpack.c.l.bf16 %v1712_v23  ;;  %v849_v9 = vunpack.c.h.bf16 %v1712_v23 }
 0x160   : > { %v755_v5 = vadd.f32 %v754_v61, %v735_v62  ;;  %v786_v62 = vadd.f32 %v785_v52, %v777_v59  ;;  %v1710_v61 = vld [vmem:[%s2355_s11 + $0x60] sm:$0xff]  }
 0x161   : > { %v822_v8 = vunpack.c.l.bf16 %v1710_v61  ;;  %v831_v19 = vunpack.c.h.bf16 %v1710_v61  ;;  %v841_v2 = vmul.f32 %v840_v26, %v2385_v50  ;;  %v854_v12 = vmul.f32 %v849_v9, %v2417_v20 }
 0x162   : > { %2044 = vtanh.f32 %v755_v5  ;;  %v795_v5 = vadd.f32 %v794_v63, %v786_v62 }
 0x163   : > { %v823_v18 = vmul.f32 %v822_v8, %v2371_v38  ;;  %v832_v25 = vmul.f32 %v831_v19, %v2377_v42  ;;  %v834_v32 = vmul.f32 %v831_v19, %v2380_v45  ;;  %v827_v63 = vmul.f32 %v822_v8, %v2403_v7 }
 0x16c   : > { %v2045_v27 = vpop.eup %2044 }
 0x16d   : > { %v757_v29 = vsub.f32 %v699_v28, %v2045_v27 }
 0x16f   : > { %v758_v30 = vmul.f32 %v2043_v24, %v757_v29  ;;  %v824_v24 = vadd.f32 %v823_v18, %v2367_v36 }
 0x171   : > { %v2519_v33 = vadd.f32 %v2045_v27, %v758_v30  ;;  %v825_v27 = vmul.f32 %v822_v8, %v2373_v39  ;;  %v833_v29 = vadd.f32 %v832_v25, %v824_v24 }
 0x173   : > { %v796_v35 = vmul.f32 %v2519_v33, %v2396_v60  ;;  %v804_v28 = vmul.f32 %v2519_v33, %v2400_v1  ;;  %v812_v58 = vmul.f32 %v2519_v33, %v2414_v17  ;;  %v826_v31 = vadd.f32 %v825_v27, %v2369_v37 }
 0x174   : > { %v842_v41 = vadd.f32 %v841_v2, %v833_v29  ;;  %v1718_v2 = vld [vmem:[%s2355_s11 + $0x78] sm:$0xff]  }
 0x175   : > { %v797_v43 = vadd.f32 %v796_v35, %v791_v34  ;;  %v805_v21 = vadd.f32 %v804_v28, %v793_v46  ;;  %v813_v3 = vadd.f32 %v812_v58, %v2420_v22  ;;  %v850_v35 = vmul.f32 %v849_v9, %v2391_v56 }
 0x176   : > { %v835_v46 = vadd.f32 %v834_v32, %v826_v31  ;;  %v900_v31 = vunpack.c.l.bf16 %v1718_v2 }
 0x177   : > { %v1708_v47 = vmul.f32 -1.442695, %v797_v43  ;;  %v1709_v49 = vmul.f32 -1.442695, %v805_v21  ;;  %v851_v21 = vadd.f32 %v850_v35, %v842_v41  ;;  %v909_v41 = vunpack.c.h.bf16 %v1718_v2  ;;  %v1172_v2 = vld [vmem:[%s2828_s4 + $0xb0] sm:$0xff] }
 0x179   : > { %2046 = vpow2.f32 %v1708_v47  ;;  %v843_v47 = vmul.f32 %v840_v26, %v2387_v51 }
 0x17a   : > { %2048 = vpow2.f32 %v1709_v49  ;;  %v852_v49 = vmul.f32 %v849_v9, %v2393_v57 }
 0x17b   : > { %v844_v48 = vadd.f32 %v843_v47, %v835_v46 }
 0x183   : > { %v2047_v44 = vpop.eup %2046 }
 0x184   : > { %v801_v55 = vadd.f32 1.0, %v2047_v44  ;;  %v2049_v0 = vpop.eup %2048 }
 0x185   : > { %v809_v4 = vadd.f32 1.0, %v2049_v0 }
 0x186   : > { %2050 = vrcp.f32 %v801_v55  ;;  %v853_v55 = vadd.f32 %v852_v49, %v844_v48  ;;  %v910_v48 = vmul.f32 %v909_v41, %v2391_v56 }
 0x187   : > { %2052 = vrcp.f32 %v809_v4 }
 0x190   : > { %v2051_v6 = vpop.eup %2050 }
 0x191   : > { %v814_v13 = vmul.f32 %v2051_v6, %v813_v3  ;;  %v2053_v30 = vpop.eup %2052  ;;  %v828_v3 = vadd.f32 %v827_v63, %v2406_v10  ;;  %v845_v6 = vmul.f32 %v840_v26, %v2412_v15 }
 0x193   : > { %v815_v16 = vadd.f32 %v814_v13, %v795_v5 }
 0x195   : > { %2054 = vtanh.f32 %v815_v16  ;;  %v1716_v16 = vld [vmem:[%s2355_s11 + $0x70] sm:$0xff]  }
 0x196   : > { %v882_v25 = vunpack.c.l.bf16 %v1716_v16  ;;  %v891_v26 = vunpack.c.h.bf16 %v1716_v16  ;;  %v942_v16 = vld [vmem:[%s2828_s4 + $0x10] sm:$0xff] }
 0x198   : > { %v883_v29 = vmul.f32 %v882_v25, %v2371_v38  ;;  %v892_v9 = vmul.f32 %v891_v26, %v2377_v42  ;;  %v885_v32 = vmul.f32 %v882_v25, %v2373_v39  ;;  %v894_v46 = vmul.f32 %v891_v26, %v2380_v45 }
 0x199   : > { %v903_v42 = vmul.f32 %v900_v31, %v2387_v51  ;;  %v887_v56 = vmul.f32 %v882_v25, %v2403_v7  ;;  %v944_v25 = vld [vmem:[%s2828_s4 + $0x20] sm:$0xff] }
 0x19b   : > { %v888_v51 = vadd.f32 %v887_v56, %v2406_v10 }
 0x19f   : > { %v2055_v34 = vpop.eup %2054 }
 0x1a0   : > { %v817_v40 = vsub.f32 %v2519_v33, %v2055_v34 }
 0x1a2   : > { %v818_v43 = vmul.f32 %v2053_v30, %v817_v40  ;;  %v884_v30 = vadd.f32 %v883_v29, %v2367_v36  ;;  %v901_v40 = vmul.f32 %v900_v31, %v2385_v50  ;;  %v912_v50 = vmul.f32 %v909_v41, %v2393_v57  ;;  %v1171_v29 = vld [vmem:[%s2828_s4 + $0xa8] sm:$0xff] }
 0x1a4   : > { %v819_v28 = vadd.f32 %v2055_v34, %v818_v43  ;;  %v893_v34 = vadd.f32 %v892_v9, %v884_v30  ;;  %v886_v43 = vadd.f32 %v885_v32, %v2369_v37  ;;  %v947_v30 = vld [vmem:[%s2828_s4 + $0x38] sm:$0xff]  ;;  %v1174_v32 = vld [vmem:[%s2828_s4 + $0xc0] sm:$0xff] }
 0x1a5   : > { %v1173_v9 = vld [vmem:[%s2828_s4 + $0xb8] sm:$0xff] }
 0x1a6   : > { %v856_v44 = vmul.f32 %v819_v28, %v2396_v60  ;;  %v1916_v53 = vpack.c.bf16 %v819_v28, %v2519_v33  ;;  %v864_v52 = vmul.f32 %v819_v28, %v2400_v1  ;;  %v836_v33 = vmul.f32 %v831_v19, %v2408_v11 }
 0x1a7   : > { %v872_v4 = vmul.f32 %v819_v28, %v2414_v17  ;;  %v895_v49 = vadd.f32 %v894_v46, %v886_v43  ;;  %v951_v43 = vld [vmem:[%s2828_s4 + $0x58] sm:$0xff] }
 0x1a8   : > { %v857_v54 = vadd.f32 %v856_v44, %v851_v21  ;;  %1917 = vmatprep.subr.bf16.mxu0 %v1916_v53  ;;  %1933 = vmatprep.subr.bf16.mxu1 %v1916_v53  ;;  %v865_v58 = vadd.f32 %v864_v52, %v853_v55  ;;  %v837_v5 = vadd.f32 %v836_v33, %v828_v3  ;;  %v1177_v46 = vld [vmem:[%s2828_s4 + $0xd8] sm:$0xff] }
 0x1a9   : > { %1919 = vmatpush3.bf16.msra.mxu0 %v1916_v53  ;;  %1935 = vmatpush3.bf16.msra.mxu1 %v1916_v53  ;;  %v873_v8 = vadd.f32 %v872_v4, %v2420_v22  ;;  %v902_v21 = vadd.f32 %v901_v40, %v893_v34  ;;  %v904_v53 = vadd.f32 %v903_v42, %v895_v49  ;;  %v949_v34 = vld [vmem:[%s2828_s4 + $0x48] sm:$0xff]  ;;  %v1180_v49 = vld [vmem:[%s2828_s4 + $0xf0] sm:$0xff]  ;;  %v955_v42 = vld [vmem:[%s2828_s4 + $0x78] sm:$0xff] }
 0x1aa   : > { %v1714_v59 = vmul.f32 -1.442695, %v857_v54  ;;  %v1715_v62 = vmul.f32 -1.442695, %v865_v58  ;;  %v846_v13 = vadd.f32 %v845_v6, %v837_v5  ;;  %v1175_v40 = vld [vmem:[%s2828_s4 + $0xc8] sm:$0xff] }
 0x1ab   : > { %v911_v39 = vadd.f32 %v910_v48, %v902_v21  ;;  %v913_v37 = vadd.f32 %v912_v50, %v904_v53  ;;  %v953_v21 = vld [vmem:[%s2828_s4 + $0x68] sm:$0xff] }
 0x1ac   : > { %2056 = vpow2.f32 %v1714_v59  ;;  %v855_v18 = vadd.f32 %v854_v12, %v846_v13  ;;  %v1179_v48 = vld [vmem:[%s2828_s4 + $0xe8] sm:$0xff] }
 0x1ad   : > { %2058 = vpow2.f32 %v1715_v62  ;;  %v896_v62 = vmul.f32 %v891_v26, %v2408_v11  ;;  %v946_v26 = vld [vmem:[%s2828_s4 + $0x30] sm:$0xff] }
 0x1af   : > { %v897_v57 = vadd.f32 %v896_v62, %v888_v51 }
 0x1b6   : > { %v2057_v0 = vpop.eup %2056 }
 0x1b7   : > { %v861_v61 = vadd.f32 1.0, %v2057_v0  ;;  %v2059_v14 = vpop.eup %2058 }
 0x1b8   : > { %v869_v24 = vadd.f32 1.0, %v2059_v14 }
 0x1b9   : > { %2060 = vrcp.f32 %v861_v61 }
 0x1ba   : > { %2062 = vrcp.f32 %v869_v24  ;;  %v1169_v24 = vld [vmem:[%s2828_s4 + $0x98] sm:$0xff] }
 0x1c3   : > { %v2061_v23 = vpop.eup %2060 }
 0x1c4   : > { %v874_v19 = vmul.f32 %v2061_v23, %v873_v8  ;;  %v2063_v35 = vpop.eup %2062  ;;  %v943_v23 = vld [vmem:[%s2828_s4 + $0x18] sm:$0xff] }
 0x1c6   : > { %v875_v27 = vadd.f32 %v874_v19, %v855_v18  ;;  %v1168_v18 = vld [vmem:[%s2828_s4 + $0x90] sm:$0xff]  ;;  %v1170_v19 = vld [vmem:[%s2828_s4 + $0xa0] sm:$0xff] }
 0x1c8   : > { %2064 = vtanh.f32 %v875_v27  ;;  %v945_v27 = vld [vmem:[%s2828_s4 + $0x28] sm:$0xff] }
 0x1d2   : > { %v2065_v38 = vpop.eup %2064 }
 0x1d3   : > { %v877_v47 = vsub.f32 %v819_v28, %v2065_v38 }
 0x1d5   : > { %v878_v36 = vmul.f32 %v2063_v35, %v877_v47  ;;  %v1176_v35 = vld [vmem:[%s2828_s4 + $0xd0] sm:$0xff]  ;;  %v1178_v47 = vld [vmem:[%s2828_s4 + $0xe0] sm:$0xff] }
 0x1d7   : > { %v879_v44 = vadd.f32 %v2065_v38, %v878_v36  ;;  %v952_v38 = vld [vmem:[%s2828_s4 + $0x60] sm:$0xff]  ;;  %v954_v36 = vld [vmem:[%s2828_s4 + $0x70] sm:$0xff] }
 0x1d9   : > { %v916_v54 = vmul.f32 %v879_v44, %v2396_v60  ;;  %v924_v45 = vmul.f32 %v879_v44, %v2400_v1  ;;  %v905_v60 = vmul.f32 %v900_v31, %v2412_v15  ;;  %v932_v0 = vmul.f32 %v879_v44, %v2414_v17  ;;  %v948_v31 = vld [vmem:[%s2828_s4 + $0x40] sm:$0xff] }
 0x1da   : > { %v914_v1 = vmul.f32 %v909_v41, %v2417_v20  ;;  %v2156_v17 = vmov 1.0   ;;  %v941_v20 = vld [vmem:[%s2828_s4 + $0x8] sm:$0xff]  ;;  %v950_v41 = vld [vmem:[%s2828_s4 + $0x50] sm:$0xff] }
 0x1db   : > { %v917_v55 = vadd.f32 %v916_v54, %v911_v39  ;;  %v925_v28 = vadd.f32 %v924_v45, %v913_v37  ;;  %v906_v3 = vadd.f32 %v905_v60, %v897_v57  ;;  %v933_v7 = vadd.f32 %v932_v0, %v2420_v22  ;;  %v1167_v22 = vld [vmem:[%s2828_s4 + $0x88] sm:$0xff] }
 0x1dd   : > { %v1720_v59 = vmul.f32 -1.442695, %v917_v55  ;;  %v1721_v52 = vmul.f32 -1.442695, %v925_v28  ;;  %v915_v61 = vadd.f32 %v914_v1, %v906_v3 }
 0x1df   : > { %2066 = vpow2.f32 %v1720_v59 }
 0x1e0   : > { %2068 = vpow2.f32 %v1721_v52 }
 0x1e9   : > { %v2067_v58 = vpop.eup %2066 }
 0x1ea   : > { %v921_v63 = vadd.f32 1.0, %v2067_v58  ;;  %v2069_v33 = vpop.eup %2068 }
 0x1eb   : > { %v929_v6 = vadd.f32 1.0, %v2069_v33 }
 0x1ec   : > { %2070 = vrcp.f32 %v921_v63 }
 0x1ed   : > { %2072 = vrcp.f32 %v929_v6 }
 0x1f6   : > { %v2071_v5 = vpop.eup %2070 }
 0x1f7   : > { %v934_v10 = vmul.f32 %v2071_v5, %v933_v7  ;;  %v2073_v11 = vpop.eup %2072 }
 0x1f9   : > { %v935_v4 = vadd.f32 %v934_v10, %v915_v61 }
 0x1fb   : > { %2074 = vtanh.f32 %v935_v4 }
 0x205   : > { %v2075_v13 = vpop.eup %2074 }
 0x206   : > { %v937_v12 = vsub.f32 %v879_v44, %v2075_v13 }
 0x208   : > { %v938_v14 = vmul.f32 %v2073_v11, %v937_v12 }
 0x20a   : > { %v939_v15 = vadd.f32 %v2075_v13, %v938_v14 }
 0x20c   : > { %v1920_v8 = vpack.c.bf16 %v939_v15, %v879_v44  ;;  %v1181_v44 = vld [vmem:[%s2828_s4 + $0xf8] sm:$0xff] }
 0x20e   : > { %1921 = vmatprep.subr.bf16.mxu0 %v1920_v8  ;;  %1937 = vmatprep.subr.bf16.mxu1 %v1920_v8 }
 0x20f   : > { %1923 = vmatpush3.bf16.msra.mxu0 %v1920_v8  ;;  %1939 = vmatpush3.bf16.msra.mxu1 %v1920_v8 }
 0x210   : > { %1840 = vmatprep.subr.mxu0 %v2156_v17  ;;  %1882 = vmatprep.subr.mxu1 %v2156_v17 }
 0x213   : > { %1841 = vmatpush3.msra.mxu0 %v2156_v17  ;;  %1883 = vmatpush3.msra.mxu1 %v2156_v17 }
 0x214   : > { %1843 = vmatmul.mubr.msk.f32.vlgmr.msra.gmra.mrb[0].mxu0 %vm956_vm0, %v941_v20  ;;  %1885 = vmatmul.mubr.msk.f32.vlgmr.msra.gmra.mrb[0].mxu1 %vm956_vm0, %v1167_v22 }
 0x215   : > { %1845 = vmatprep.mubr.msk.f32.mxu0 %vm956_vm0, %v942_v16  ;;  %1887 = vmatprep.mubr.msk.f32.mxu1 %vm956_vm0, %v1168_v18 }
 0x218   : > { %1846 = vmatmul.mubr.msk.f32.gmra.mrb[2].mxu0 %vm956_vm0, %v943_v23  ;;  %1888 = vmatmul.mubr.msk.f32.gmra.mrb[2].mxu1 %vm956_vm0, %v1169_v24 }
 0x219   : > { %1848 = vmatprep.mubr.msk.f32.mxu0 %vm956_vm0, %v944_v25  ;;  %1890 = vmatprep.mubr.msk.f32.mxu1 %vm956_vm0, %v1170_v19 }
 0x21c   : > { %1849 = vmatmul.mubr.msk.f32.gmra.mrb[4].mxu0 %vm956_vm0, %v945_v27  ;;  %1891 = vmatmul.mubr.msk.f32.gmra.mrb[4].mxu1 %vm956_vm0, %v1171_v29 }
 0x21d   : > { %1851 = vmatprep.mubr.msk.f32.mxu0 %vm956_vm0, %v946_v26  ;;  %1893 = vmatprep.mubr.msk.f32.mxu1 %vm956_vm0, %v1172_v2 }
 0x220   : > { %1852 = vmatmul.mubr.msk.f32.gmra.mrb[6].mxu0 %vm956_vm0, %v947_v30  ;;  %1894 = vmatmul.mubr.msk.f32.gmra.mrb[6].mxu1 %vm956_vm0, %v1173_v9 }
 0x221   : > { %1854 = vmatprep.mubr.msk.f32.mxu0 %vm956_vm0, %v948_v31  ;;  %1896 = vmatprep.mubr.msk.f32.mxu1 %vm956_vm0, %v1174_v32 }
 0x224   : > { %1855 = vmatmul.mubr.msk.f32.gmra.mrb[8].mxu0 %vm956_vm0, %v949_v34  ;;  %1897 = vmatmul.mubr.msk.f32.gmra.mrb[8].mxu1 %vm956_vm0, %v1175_v40 }
 0x225   : > { %1857 = vmatprep.mubr.msk.f32.mxu0 %vm956_vm0, %v950_v41  ;;  %1899 = vmatprep.mubr.msk.f32.mxu1 %vm956_vm0, %v1176_v35 }
 0x228   : > { %1858 = vmatmul.mubr.msk.f32.gmra.mrb[10].mxu0 %vm956_vm0, %v951_v43  ;;  %1900 = vmatmul.mubr.msk.f32.gmra.mrb[10].mxu1 %vm956_vm0, %v1177_v46 }
 0x229   : > { %1860 = vmatprep.mubr.msk.f32.mxu0 %vm956_vm0, %v952_v38  ;;  %1902 = vmatprep.mubr.msk.f32.mxu1 %vm956_vm0, %v1178_v47 }
 0x22c   : > { %1861 = vmatmul.mubr.msk.f32.gmra.mrb[12].mxu0 %vm956_vm0, %v953_v21  ;;  %1903 = vmatmul.mubr.msk.f32.gmra.mrb[12].mxu1 %vm956_vm0, %v1179_v48 }
 0x22d   : > { %1863 = vmatprep.mubr.msk.f32.mxu0 %vm956_vm0, %v954_v36  ;;  %1905 = vmatprep.mubr.msk.f32.mxu1 %vm956_vm0, %v1180_v49 }
 0x230   : > { %1864 = vmatmul.mubr.msk.f32.gmra.mrb[14].mxu0 %vm956_vm0, %v955_v42  ;;  %1906 = vmatmul.mubr.msk.f32.gmra.mrb[14].mxu1 %vm956_vm0, %v1181_v44 }
 0x2e7   : > { %v1844_v39 = vpop.f32.mrb[0].mxu0  ;;  %v1886_v53 = vpop.f32.mrb[0].mxu1 }
 0x2e8   : > { %1151 = vst [vmem:[%s2708_s7 + $0x8] sm:$0xff] %v1844_v39  ;;  %1755 = vst [vmem:[%s2708_s7 + $0x88] sm:$0xff] %v1886_v53  ;;  %v1071_v50 = vpop.f32.mrb[1].mxu0  ;;  %v1296_v54 = vpop.f32.mrb[1].mxu1 }
 0x2e9   : > { %1150 = vst [vmem:[%s2708_s7] sm:$0xff] %v1071_v50  ;;  %1754 = vst [vmem:[%s2708_s7 + $0x80] sm:$0xff] %v1296_v54 }
 0x2eb   : > { %v1847_v55 = vpop.f32.mrb[2].mxu0  ;;  %v1889_v37 = vpop.f32.mrb[2].mxu1 }
 0x2ec   : > { %1153 = vst [vmem:[%s2708_s7 + $0x18] sm:$0xff] %v1847_v55  ;;  %1757 = vst [vmem:[%s2708_s7 + $0x98] sm:$0xff] %v1889_v37  ;;  %v1081_v59 = vpop.f32.mrb[3].mxu0  ;;  %v1306_v45 = vpop.f32.mrb[3].mxu1 }
 0x2ed   : > { %1152 = vst [vmem:[%s2708_s7 + $0x10] sm:$0xff] %v1081_v59  ;;  %1756 = vst [vmem:[%s2708_s7 + $0x90] sm:$0xff] %v1306_v45 }
 0x2ef   : > { %v1850_v28 = vpop.f32.mrb[4].mxu0  ;;  %v1892_v56 = vpop.f32.mrb[4].mxu1  ;;  %v1492_v17 = vld [vmem:[%s2708_s7 + $0x8] sm:$0xff] (%p2842_p1) }
 0x2f0   : > { %1155 = vst [vmem:[%s2708_s7 + $0x28] sm:$0xff] %v1850_v28  ;;  %1759 = vst [vmem:[%s2708_s7 + $0xa8] sm:$0xff] %v1892_v56  ;;  %v1091_v52 = vpop.f32.mrb[5].mxu0  ;;  %v1316_v58 = vpop.f32.mrb[5].mxu1  ;;  %v1490_v8 = vld [vmem:[%s2708_s7] sm:$0xff] (%p2842_p1)  ;;  %v1524_v32 = vld [vmem:[%s2708_s7 + $0x88] sm:$0xff] (%p2842_p1) }
 0x2f1   : > { %1154 = vst [vmem:[%s2708_s7 + $0x20] sm:$0xff] %v1091_v52  ;;  %1758 = vst [vmem:[%s2708_s7 + $0xa0] sm:$0xff] %v1316_v58  ;;  %v1522_v31 = vld [vmem:[%s2708_s7 + $0x80] sm:$0xff] (%p2842_p1) }
 0x2f2   : > { %1491 = vst [vmem:[%s2751_s9] sm:$0xff] (%p2842_p1), %v1490_v8  ;;  %1493 = vst [vmem:[%s2751_s9 + $0x10] sm:$0xff] (%p2842_p1), %v1492_v17 }
 0x2f3   : > { %v1853_v51 = vpop.f32.mrb[6].mxu0  ;;  %v1895_v62 = vpop.f32.mrb[6].mxu1  ;;  %v1496_v22 = vld [vmem:[%s2708_s7 + $0x18] sm:$0xff] (%p2842_p1)  ;;  %1523 = vst [vmem:[%s2751_s9 + $0x100] sm:$0xff] (%p2842_p1), %v1522_v31  ;;  %1525 = vst [vmem:[%s2751_s9 + $0x110] sm:$0xff] (%p2842_p1), %v1524_v32 }
 0x2f4   : > { %1157 = vst [vmem:[%s2708_s7 + $0x38] sm:$0xff] %v1853_v51  ;;  %1761 = vst [vmem:[%s2708_s7 + $0xb8] sm:$0xff] %v1895_v62  ;;  %v1101_v63 = vpop.f32.mrb[7].mxu0  ;;  %v1326_v57 = vpop.f32.mrb[7].mxu1  ;;  %v1494_v20 = vld [vmem:[%s2708_s7 + $0x10] sm:$0xff] (%p2842_p1)  ;;  %v1528_v40 = vld [vmem:[%s2708_s7 + $0x98] sm:$0xff] (%p2842_p1) }
 0x2f5   : > { %1156 = vst [vmem:[%s2708_s7 + $0x30] sm:$0xff] %v1101_v63  ;;  %1760 = vst [vmem:[%s2708_s7 + $0xb0] sm:$0xff] %v1326_v57  ;;  %v1526_v34 = vld [vmem:[%s2708_s7 + $0x90] sm:$0xff] (%p2842_p1) }
 0x2f6   : > { %1495 = vst [vmem:[%s2751_s9 + $0x20] sm:$0xff] (%p2842_p1), %v1494_v20  ;;  %1497 = vst [vmem:[%s2751_s9 + $0x30] sm:$0xff] (%p2842_p1), %v1496_v22 }
 0x2f7   : > { %v1856_v60 = vpop.f32.mrb[8].mxu0  ;;  %v1898_v0 = vpop.f32.mrb[8].mxu1  ;;  %v1500_v18 = vld [vmem:[%s2708_s7 + $0x28] sm:$0xff] (%p2842_p1)  ;;  %1527 = vst [vmem:[%s2751_s9 + $0x120] sm:$0xff] (%p2842_p1), %v1526_v34  ;;  %1529 = vst [vmem:[%s2751_s9 + $0x130] sm:$0xff] (%p2842_p1), %v1528_v40 }
 0x2f8   : > { %1159 = vst [vmem:[%s2708_s7 + $0x48] sm:$0xff] %v1856_v60  ;;  %1763 = vst [vmem:[%s2708_s7 + $0xc8] sm:$0xff] %v1898_v0  ;;  %v1111_v3 = vpop.f32.mrb[9].mxu0  ;;  %v1336_v1 = vpop.f32.mrb[9].mxu1  ;;  %v1498_v16 = vld [vmem:[%s2708_s7 + $0x20] sm:$0xff] (%p2842_p1)  ;;  %v1532_v35 = vld [vmem:[%s2708_s7 + $0xa8] sm:$0xff] (%p2842_p1) }
 0x2f9   : > { %1158 = vst [vmem:[%s2708_s7 + $0x40] sm:$0xff] %v1111_v3  ;;  %1762 = vst [vmem:[%s2708_s7 + $0xc0] sm:$0xff] %v1336_v1  ;;  %v1530_v41 = vld [vmem:[%s2708_s7 + $0xa0] sm:$0xff] (%p2842_p1) }
 0x2fa   : > { %1499 = vst [vmem:[%s2751_s9 + $0x40] sm:$0xff] (%p2842_p1), %v1498_v16  ;;  %1501 = vst [vmem:[%s2751_s9 + $0x50] sm:$0xff] (%p2842_p1), %v1500_v18 }
 0x2fb   : > { %v1859_v33 = vpop.f32.mrb[10].mxu0  ;;  %v1901_v7 = vpop.f32.mrb[10].mxu1  ;;  %v1504_v24 = vld [vmem:[%s2708_s7 + $0x38] sm:$0xff] (%p2842_p1)  ;;  %1531 = vst [vmem:[%s2751_s9 + $0x140] sm:$0xff] (%p2842_p1), %v1530_v41  ;;  %1533 = vst [vmem:[%s2751_s9 + $0x150] sm:$0xff] (%p2842_p1), %v1532_v35 }
 0x2fc   : > { %1161 = vst [vmem:[%s2708_s7 + $0x58] sm:$0xff] %v1859_v33  ;;  %1765 = vst [vmem:[%s2708_s7 + $0xd8] sm:$0xff] %v1901_v7  ;;  %v1121_v61 = vpop.f32.mrb[11].mxu0  ;;  %v1346_v5 = vpop.f32.mrb[11].mxu1  ;;  %v1502_v23 = vld [vmem:[%s2708_s7 + $0x30] sm:$0xff] (%p2842_p1)  ;;  %v1536_v46 = vld [vmem:[%s2708_s7 + $0xb8] sm:$0xff] (%p2842_p1) }
 0x2fd   : > { %1160 = vst [vmem:[%s2708_s7 + $0x50] sm:$0xff] %v1121_v61  ;;  %1764 = vst [vmem:[%s2708_s7 + $0xd0] sm:$0xff] %v1346_v5  ;;  %v1534_v43 = vld [vmem:[%s2708_s7 + $0xb0] sm:$0xff] (%p2842_p1) }
 0x2fe   : > { %1503 = vst [vmem:[%s2751_s9 + $0x60] sm:$0xff] (%p2842_p1), %v1502_v23  ;;  %1505 = vst [vmem:[%s2751_s9 + $0x70] sm:$0xff] (%p2842_p1), %v1504_v24 }
 0x2ff   : > { %v1862_v6 = vpop.f32.mrb[12].mxu0  ;;  %v1904_v10 = vpop.f32.mrb[12].mxu1  ;;  %1398 = sbr.rel (!%p2842_p1) target bundleno = 783 (0x30f), region = 97  ;;  %v1508_v19 = vld [vmem:[%s2708_s7 + $0x48] sm:$0xff] (%p2842_p1)  ;;  %1535 = vst [vmem:[%s2751_s9 + $0x160] sm:$0xff] (%p2842_p1), %v1534_v43  ;;  %1537 = vst [vmem:[%s2751_s9 + $0x170] sm:$0xff] (%p2842_p1), %v1536_v46 }
 0x300   : > { %1163 = vst [vmem:[%s2708_s7 + $0x68] sm:$0xff] %v1862_v6  ;;  %1767 = vst [vmem:[%s2708_s7 + $0xe8] sm:$0xff] %v1904_v10  ;;  %v1131_v4 = vpop.f32.mrb[13].mxu0  ;;  %v1356_v11 = vpop.f32.mrb[13].mxu1  ;;  %v1506_v25 = vld [vmem:[%s2708_s7 + $0x40] sm:$0xff] (%p2842_p1)  ;;  %v1540_v47 = vld [vmem:[%s2708_s7 + $0xc8] sm:$0xff] (%p2842_p1) }
 0x301   : > { %1162 = vst [vmem:[%s2708_s7 + $0x60] sm:$0xff] %v1131_v4  ;;  %1766 = vst [vmem:[%s2708_s7 + $0xe0] sm:$0xff] %v1356_v11  ;;  %v1538_v38 = vld [vmem:[%s2708_s7 + $0xc0] sm:$0xff] (%p2842_p1) }
 0x302   : > { %1507 = vst [vmem:[%s2751_s9 + $0x80] sm:$0xff] (%p2842_p1), %v1506_v25  ;;  %1509 = vst [vmem:[%s2751_s9 + $0x90] sm:$0xff] (%p2842_p1), %v1508_v19 }
 0x303   : > { %v1865_v13 = vpop.f32.mrb[14].mxu0  ;;  %v1907_v12 = vpop.f32.mrb[14].mxu1  ;;  %v1512_v29 = vld [vmem:[%s2708_s7 + $0x58] sm:$0xff] (%p2842_p1)  ;;  %1539 = vst [vmem:[%s2751_s9 + $0x180] sm:$0xff] (%p2842_p1), %v1538_v38  ;;  %1541 = vst [vmem:[%s2751_s9 + $0x190] sm:$0xff] (%p2842_p1), %v1540_v47 }
 0x304   : > { %1165 = vst [vmem:[%s2708_s7 + $0x78] sm:$0xff] %v1865_v13  ;;  %1769 = vst [vmem:[%s2708_s7 + $0xf8] sm:$0xff] %v1907_v12  ;;  %v1141_v14 = vpop.f32.mrb[15].mxu0  ;;  %v1366_v15 = vpop.f32.mrb[15].mxu1  ;;  %v1510_v27 = vld [vmem:[%s2708_s7 + $0x50] sm:$0xff] (%p2842_p1)  ;;  %v1544_v48 = vld [vmem:[%s2708_s7 + $0xd8] sm:$0xff] (%p2842_p1) }
 0x305   : > { %1164 = vst [vmem:[%s2708_s7 + $0x70] sm:$0xff] %v1141_v14  ;;  %1768 = vst [vmem:[%s2708_s7 + $0xf0] sm:$0xff] %v1366_v15  ;;  %v1542_v21 = vld [vmem:[%s2708_s7 + $0xd0] sm:$0xff] (%p2842_p1) }
 0x306   : > { %1511 = vst [vmem:[%s2751_s9 + $0xa0] sm:$0xff] %v1510_v27  ;;  %1513 = vst [vmem:[%s2751_s9 + $0xb0] sm:$0xff] %v1512_v29 }
 0x307   : > { %v1516_v2 = vld [vmem:[%s2708_s7 + $0x68] sm:$0xff]  ;;  %1543 = vst [vmem:[%s2751_s9 + $0x1a0] sm:$0xff] %v1542_v21  ;;  %1545 = vst [vmem:[%s2751_s9 + $0x1b0] sm:$0xff] %v1544_v48 }
 0x308   : > { %v1514_v26 = vld [vmem:[%s2708_s7 + $0x60] sm:$0xff]  ;;  %1517 = vst [vmem:[%s2751_s9 + $0xd0] sm:$0xff] %v1516_v2  ;;  %v1548_v49 = vld [vmem:[%s2708_s7 + $0xe8] sm:$0xff] }
 0x309   : > { %1515 = vst [vmem:[%s2751_s9 + $0xc0] sm:$0xff] %v1514_v26  ;;  %v1546_v36 = vld [vmem:[%s2708_s7 + $0xe0] sm:$0xff]  ;;  %1549 = vst [vmem:[%s2751_s9 + $0x1d0] sm:$0xff] %v1548_v49 }
 0x30a   : > { %1547 = vst [vmem:[%s2751_s9 + $0x1c0] sm:$0xff] %v1546_v36 }
 0x30b   : > { %v1520_v9 = vld [vmem:[%s2708_s7 + $0x78] sm:$0xff] }
 0x30c   : > { %v1518_v30 = vld [vmem:[%s2708_s7 + $0x70] sm:$0xff]  ;;  %1521 = vst [vmem:[%s2751_s9 + $0xf0] sm:$0xff] %v1520_v9  ;;  %v1552_v44 = vld [vmem:[%s2708_s7 + $0xf8] sm:$0xff] }
 0x30d   : > { %1519 = vst [vmem:[%s2751_s9 + $0xe0] sm:$0xff] %v1518_v30  ;;  %v1550_v42 = vld [vmem:[%s2708_s7 + $0xf0] sm:$0xff]  ;;  %1553 = vst [vmem:[%s2751_s9 + $0x1f0] sm:$0xff] %v1552_v44 }
 0x30e   : > { %1551 = vst [vmem:[%s2751_s9 + $0x1e0] sm:$0xff] %v1550_v42 }
 0x30f PF: > { %p14_p2 = scmp.ge.s32.totalorder %s2206_s22, 4   ;;  %s2843_s18 = smov %s2147_s19 }
 0x310   : > { %s2844_s19 = smov %s2216_s25  ;;  %s2845_s20 = smov %s2206_s22 }
 0x311   :  { %16 = sbr.rel (!%p14_p2) target bundleno = 3 (0x3), region = 199 }
 0x318   :  { %1569 = vsyncpa [#allocation4], 1 }
 0x319   :  { %1571 = vsyncpa [#allocation4 + $0x1], 1 }
 0x31a   :  { %1572 = vsyncpa [#allocation6], 1 }

</bundles_post_ra>
